<compile_context>
chip_gen: v7x
topology: tpu7x:2x2x1
jax: 0.10.0
libtpu: 0.0.40
codegen_flags: <defaults>
</compile_context>

<pallas_src>
import math

import jax
import jax.numpy as jnp
from jax import lax
from jax.experimental import pallas as pl
from jax.experimental.pallas import tpu as pltpu

_BIG = 1e30  # "infinity" sentinel for Prim's min-distance vector


# --------------------------------------------------------------------------
# Fused kernel: squared pdist (VPU) + Prim MST + StructureElementLayer + MLP
# --------------------------------------------------------------------------
def _topo_model_kernel(x_ref, xt_ref, alpha0_ref, c1_ref, s21_ref,
                       w1t_ref, b1_ref, w2t_ref, b2_ref, out_ref):
    x = x_ref[0]                                   # (N, D)
    xt = xt_ref[0]                                 # (D, N)
    N, D = x.shape

    # Squared distance matrix, pure VPU: sum_d (x[i,d] - x[j,d])^2.
    d2 = jnp.zeros((N, N), jnp.float32)
    for d in range(D):                             # D is tiny and static
        ci = x[:, d:d + 1]                         # (N, 1)
        rj = xt[d:d + 1, :]                        # (1, N)
        diff = ci - rj                             # (N, N) broadcast, no transpose
        d2 = d2 + diff * diff

    lane = lax.broadcasted_iota(jnp.int32, (1, N), 1)
    sub = lax.broadcasted_iota(jnp.int32, (N, N), 0)

    visited0 = (lane == 0).astype(jnp.float32)               # (1, N) 0/1 mask
    mind0 = jnp.where(lane == 0, _BIG, d2[0:1, :])            # (1, N)
    deaths0 = jnp.zeros((1, N), jnp.float32)

    def body(i, carry):
        visited, mind, deaths = carry
        dmin = jnp.min(mind)                                  # squared MST edge weight
        j = jnp.min(jnp.where(mind == dmin, lane, N))         # smallest-index argmin
        deaths = jnp.where(lane == i, dmin, deaths)           # record death i
        visited = jnp.where(lane == j, 1.0, visited)          # mark j visited
        # Row j of d2 via masked sublane reduction (no dynamic slicing needed).
        row_j = jnp.sum(jnp.where(sub == j, d2, 0.0), axis=0, keepdims=True)
        mind = jnp.where(visited > 0.5, _BIG, jnp.minimum(mind, row_j))
        return visited, mind, deaths

    _, _, deaths_sq = lax.fori_loop(0, N - 1, body, (visited0, mind0, deaths0),
                                    unroll=True)
    # sqrt only on the (N-1) finite deaths, not on N^2 distances.
    d = jnp.sqrt(deaths_sq[:, : N - 1])                       # (1, P) row

    # StructureElementLayer on dim-0 bars (birth == 0):
    #   struct[k] = sum_p exp(-(alpha0[k] + s21[k] * (c1[k] - d_p)^2))
    diff = c1_ref[...] - d                                    # (K, 1)-(1, P) -> (K, P)
    arg = alpha0_ref[...] + s21_ref[...] * diff * diff        # (K, P)
    struct = jnp.sum(jnp.exp(-arg), axis=1, keepdims=True)    # (K, 1) lane reduce

    # Linear -> ReLU -> Linear in column form (weights pre-transposed).
    h = jnp.dot(w1t_ref[...], struct,
                preferred_element_type=jnp.float32) + b1_ref[...]   # (L, 1)
    h = jnp.maximum(h, 0.0)
    out = jnp.dot(w2t_ref[...], h,
                  preferred_element_type=jnp.float32) + b2_ref[...]  # (O, 1)
    out_ref[0] = out                                           # single store


# --------------------------------------------------------------------------
# Full forward pass of TopologicalModel
# --------------------------------------------------------------------------
def topological_model_forward(x, params):
    centres, sharpness, w1, b1, w2, b2 = params
    B, N, D = x.shape
    K = centres.shape[0]
    L = w1.shape[1]
    O = w2.shape[1]

    x = x.astype(jnp.float32)
    xt = jnp.swapaxes(x, 1, 2)                                 # (B, D, N) wrapper glue

    # Batch-invariant parameter math hoisted out of the kernel.
    c = centres.astype(jnp.float32)                            # (K, 2)
    s2 = jnp.square(sharpness.astype(jnp.float32))             # (K, 2)
    alpha0 = (s2[:, 0] * c[:, 0] * c[:, 0])[:, None]           # (K, 1) birth term
    c1 = c[:, 1:2]                                             # (K, 1)
    s21 = s2[:, 1:2]                                           # (K, 1)
    w1t = w1.astype(jnp.float32).T                             # (L, K)
    b1c = b1.astype(jnp.float32).reshape(L, 1)                 # (L, 1)
    w2t = w2.astype(jnp.float32).T                             # (O, L)
    b2c = b2.astype(jnp.float32).reshape(O, 1)                 # (O, 1)

    out = pl.pallas_call(
        _topo_model_kernel,
        out_shape=jax.ShapeDtypeStruct((B, O, 1), jnp.float32),
        grid=(B,),
        in_specs=[
            pl.BlockSpec((1, N, D), lambda b: (b, 0, 0)),
            pl.BlockSpec((1, D, N), lambda b: (b, 0, 0)),
            # Constant block index -> params are DMA'd once, then re-used.
            pl.BlockSpec((K, 1), lambda b: (0, 0)),
            pl.BlockSpec((K, 1), lambda b: (0, 0)),
            pl.BlockSpec((K, 1), lambda b: (0, 0)),
            pl.BlockSpec((L, K), lambda b: (0, 0)),
            pl.BlockSpec((L, 1), lambda b: (0, 0)),
            pl.BlockSpec((O, L), lambda b: (0, 0)),
            pl.BlockSpec((O, 1), lambda b: (0, 0)),
        ],
        out_specs=pl.BlockSpec((1, O, 1), lambda b: (b, 0, 0)),
        compiler_params=pltpu.CompilerParams(
            dimension_semantics=("parallel",)),                # megacore-friendly
    )(x, xt, alpha0, c1, s21, w1t, b1c, w2t, b2c)
    return out[:, :, 0]                                        # (B, O)


# --------------------------------------------------------------------------
# Pure-JAX reference (semantic ground truth of the torch module)
# --------------------------------------------------------------------------
def _reference_forward(x, params):
    centres, sharpness, w1, b1, w2, b2 = params
    B, N, _ = x.shape
    d2 = jnp.sum((x[:, :, None, :] - x[:, None, :, :]) ** 2, axis=-1)

    def mst(dmat):
        idx = jnp.arange(N)
        visited0 = idx == 0
        mind0 = jnp.where(visited0, _BIG, dmat[0])
        deaths0 = jnp.zeros((N,), jnp.float32)

        def body(i, carry):
            visited, mind, deaths = carry
            j = jnp.argmin(mind)
            deaths = deaths.at[i].set(mind[j])
            visited = visited.at[j].set(True)
            mind = jnp.where(visited, _BIG, jnp.minimum(mind, dmat[j]))
            return visited, mind, deaths

        _, _, deaths = lax.fori_loop(0, N - 1, body, (visited0, mind0, deaths0))
        return jnp.sqrt(deaths[: N - 1])

    deaths = jax.vmap(mst)(d2)                                 # (B, N-1)
    pers = jnp.stack([jnp.zeros_like(deaths), deaths], -1)     # (B, P, 2)
    s2 = jnp.square(sharpness)
    diff = centres[None, None, :, :] - pers[:, :, None, :]     # (B, P, K, 2)
    arg = jnp.sum(s2[None, None] * diff * diff, axis=-1)       # (B, P, K)
    struct = jnp.sum(jnp.exp(-arg), axis=1)                    # (B, K)
    h = jnp.maximum(struct @ w1 + b1, 0.0)
    return h @ w2 + b2


if __name__ == "__main__":
    # Small, deterministic example shapes.
    B, N, D = 2, 16, 3                       # batch of 2 point clouds, 16 pts in R^3
    n_elements, latent_dim, output_dim = 8, 32, 2

    key = jax.random.PRNGKey(0)
    kx, kc, kw1, kb1, kw2, kb2 = jax.random.split(key, 6)

    x = jax.random.normal(kx, (B, N, D), dtype=jnp.float32)

    # StructureElementLayer params: centres ~ U[0,1), sharpness = 3 (torch init).
    centres = jax.random.uniform(kc, (n_elements, 2), dtype=jnp.float32)
    sharpness = jnp.full((n_elements, 2), 3.0, dtype=jnp.float32)

    # Linear layers (weights stored already transposed to (in, out)); bounds
    # mimic torch.nn.Linear's default uniform init.
    bound1 = 1.0 / math.sqrt(n_elements)
    w1 = jax.random.uniform(kw1, (n_elements, latent_dim), jnp.float32, -bound1, bound1)
    b1 = jax.random.uniform(kb1, (1, latent_dim), jnp.float32, -bound1, bound1)
    bound2 = 1.0 / math.sqrt(latent_dim)
    w2 = jax.random.uniform(kw2, (latent_dim, output_dim), jnp.float32, -bound2, bound2)
    b2 = jax.random.uniform(kb2, (1, output_dim), jnp.float32, -bound2, bound2)

    params = (centres, sharpness, w1, b1, w2, b2)

    y = jax.jit(topological_model_forward)(x, params)
    y = jax.block_until_ready(y)

    assert y.shape == (B, output_dim), y.shape
    assert bool(jnp.all(jnp.isfinite(y)))

    y_ref = jax.jit(_reference_forward)(x, params)
    y_ref = jax.block_until_ready(y_ref)
    assert bool(jnp.allclose(y, y_ref, atol=1e-3, rtol=1e-3)), (y, y_ref)

    print("KERNEL_OK")
</pallas_src>

<mosaic_0001>
module attributes {stable_mosaic.version = 11 : i64} {
  func.func @_topo_model_kernel(%arg0: i32, %arg1: memref<1x16x3xf32, #tpu.memory_space<vmem>>, %arg2: memref<1x3x16xf32, #tpu.memory_space<vmem>>, %arg3: memref<8x1xf32, #tpu.memory_space<vmem>>, %arg4: memref<8x1xf32, #tpu.memory_space<vmem>>, %arg5: memref<8x1xf32, #tpu.memory_space<vmem>>, %arg6: memref<32x8xf32, #tpu.memory_space<vmem>>, %arg7: memref<32x1xf32, #tpu.memory_space<vmem>>, %arg8: memref<2x32xf32, #tpu.memory_space<vmem>>, %arg9: memref<2x1xf32, #tpu.memory_space<vmem>>, %arg10: memref<1x2x1xf32, #tpu.memory_space<vmem>>) attributes {dimension_semantics = [#tpu.dimension_semantics<parallel>], iteration_bounds = array<i64: 2>, scalar_prefetch = 0 : i64, scratch_operands = 0 : i64, tpu.core_type = #tpu.core_type<tc>, window_params = [{transform_indices = @transform_0, window_bounds = array<i64: 1, 16, 3>}, {transform_indices = @transform_1, window_bounds = array<i64: 1, 3, 16>}, {pipeline_mode = #tpu.pipeline_mode<synchronous>, transform_indices = @transform_2, window_bounds = array<i64: 8, 1>}, {pipeline_mode = #tpu.pipeline_mode<synchronous>, transform_indices = @transform_3, window_bounds = array<i64: 8, 1>}, {pipeline_mode = #tpu.pipeline_mode<synchronous>, transform_indices = @transform_4, window_bounds = array<i64: 8, 1>}, {pipeline_mode = #tpu.pipeline_mode<synchronous>, transform_indices = @transform_5, window_bounds = array<i64: 32, 8>}, {pipeline_mode = #tpu.pipeline_mode<synchronous>, transform_indices = @transform_6, window_bounds = array<i64: 32, 1>}, {pipeline_mode = #tpu.pipeline_mode<synchronous>, transform_indices = @transform_7, window_bounds = array<i64: 2, 32>}, {pipeline_mode = #tpu.pipeline_mode<synchronous>, transform_indices = @transform_8, window_bounds = array<i64: 2, 1>}, {transform_indices = @transform_9, window_bounds = array<i64: 1, 2, 1>}]} {
    %c0 = arith.constant 0 : index
    %c0_0 = arith.constant 0 : index
    %c0_1 = arith.constant 0 : index
    %0 = vector.load %arg1[%c0, %c0_0, %c0_1] : memref<1x16x3xf32, #tpu.memory_space<vmem>>, vector<1x16x3xf32>
    %1 = vector.shape_cast %0 : vector<1x16x3xf32> to vector<16x3xf32>
    %c0_2 = arith.constant 0 : index
    %c0_3 = arith.constant 0 : index
    %c0_4 = arith.constant 0 : index
    %2 = vector.load %arg2[%c0_2, %c0_3, %c0_4] : memref<1x3x16xf32, #tpu.memory_space<vmem>>, vector<1x3x16xf32>
    %3 = vector.shape_cast %2 : vector<1x3x16xf32> to vector<3x16xf32>
    %cst = arith.constant 0.000000e+00 : f32
    %4 = vector.broadcast %cst : f32 to vector<16x16xf32>
    %5 = vector.extract_strided_slice %1 {offsets = [0, 0], sizes = [16, 1], strides = [1, 1]} : vector<16x3xf32> to vector<16x1xf32>
    %6 = vector.extract_strided_slice %3 {offsets = [0, 0], sizes = [1, 16], strides = [1, 1]} : vector<3x16xf32> to vector<1x16xf32>
    %7 = vector.broadcast %5 : vector<16x1xf32> to vector<16x16xf32>
    %8 = vector.broadcast %6 : vector<1x16xf32> to vector<16x16xf32>
    %9 = arith.subf %7, %8 : vector<16x16xf32>
    %10 = arith.mulf %9, %9 : vector<16x16xf32>
    %11 = arith.addf %4, %10 : vector<16x16xf32>
    %12 = vector.extract_strided_slice %1 {offsets = [0, 1], sizes = [16, 1], strides = [1, 1]} : vector<16x3xf32> to vector<16x1xf32>
    %13 = vector.extract_strided_slice %3 {offsets = [1, 0], sizes = [1, 16], strides = [1, 1]} : vector<3x16xf32> to vector<1x16xf32>
    %14 = vector.broadcast %12 : vector<16x1xf32> to vector<16x16xf32>
    %15 = vector.broadcast %13 : vector<1x16xf32> to vector<16x16xf32>
    %16 = arith.subf %14, %15 : vector<16x16xf32>
    %17 = arith.mulf %16, %16 : vector<16x16xf32>
    %18 = arith.addf %11, %17 : vector<16x16xf32>
    %19 = vector.extract_strided_slice %1 {offsets = [0, 2], sizes = [16, 1], strides = [1, 1]} : vector<16x3xf32> to vector<16x1xf32>
    %20 = vector.extract_strided_slice %3 {offsets = [2, 0], sizes = [1, 16], strides = [1, 1]} : vector<3x16xf32> to vector<1x16xf32>
    %21 = vector.broadcast %19 : vector<16x1xf32> to vector<16x16xf32>
    %22 = vector.broadcast %20 : vector<1x16xf32> to vector<16x16xf32>
    %23 = arith.subf %21, %22 : vector<16x16xf32>
    %24 = arith.mulf %23, %23 : vector<16x16xf32>
    %25 = arith.addf %18, %24 : vector<16x16xf32>
    %26 = tpu.iota {dimensions = array<i32: 1>} : vector<1x16xi32>
    %27 = tpu.iota {dimensions = array<i32: 0>} : vector<16x16xi32>
    %c0_i32 = arith.constant 0 : i32
    %28 = vector.broadcast %c0_i32 : i32 to vector<1x16xi32>
    %29 = arith.cmpi eq, %26, %28 : vector<1x16xi32>
    %30 = arith.extui %29 : vector<1x16xi1> to vector<1x16xi32>
    %31 = arith.sitofp %30 : vector<1x16xi32> to vector<1x16xf32>
    %c0_i32_5 = arith.constant 0 : i32
    %32 = vector.broadcast %c0_i32_5 : i32 to vector<1x16xi32>
    %33 = arith.cmpi eq, %26, %32 : vector<1x16xi32>
    %34 = vector.extract_strided_slice %25 {offsets = [0, 0], sizes = [1, 16], strides = [1, 1]} : vector<16x16xf32> to vector<1x16xf32>
    %cst_6 = arith.constant 1.000000e+30 : f32
    %35 = vector.broadcast %cst_6 : f32 to vector<1x16xf32>
    %36 = arith.select %33, %35, %34 : vector<1x16xi1>, vector<1x16xf32>
    %cst_7 = arith.constant 0.000000e+00 : f32
    %37 = vector.broadcast %cst_7 : f32 to vector<1x16xf32>
    %c0_i32_8 = arith.constant 0 : i32
    %38 = vector.shape_cast %36 : vector<1x16xf32> to vector<1x1x16xf32>
    %cst_9 = arith.constant dense<0x7F800000> : vector<1xf32>
    %39 = vector.multi_reduction <minimumf>, %38, %cst_9 [1, 2] : vector<1x1x16xf32> to vector<1xf32>
    %40 = vector.shape_cast %39 : vector<1xf32> to vector<1x1x1xf32>
    %41 = vector.extract %40[0, 0, 0] : f32 from vector<1x1x1xf32>
    %42 = vector.broadcast %41 : f32 to vector<1x16xf32>
    %43 = arith.cmpf oeq, %36, %42 : vector<1x16xf32>
    %c16_i32 = arith.constant 16 : i32
    %44 = vector.broadcast %c16_i32 : i32 to vector<1x16xi32>
    %45 = arith.select %43, %26, %44 : vector<1x16xi1>, vector<1x16xi32>
    %46 = vector.shape_cast %45 : vector<1x16xi32> to vector<1x1x16xi32>
    %cst_10 = arith.constant dense<2147483647> : vector<1xi32>
    %47 = vector.multi_reduction <minsi>, %46, %cst_10 [1, 2] : vector<1x1x16xi32> to vector<1xi32>
    %48 = vector.shape_cast %47 : vector<1xi32> to vector<1x1x1xi32>
    %49 = vector.extract %48[0, 0, 0] : i32 from vector<1x1x1xi32>
    %50 = vector.broadcast %c0_i32_8 : i32 to vector<1x16xi32>
    %51 = arith.cmpi eq, %26, %50 : vector<1x16xi32>
    %52 = vector.broadcast %41 : f32 to vector<1x16xf32>
    %53 = arith.select %51, %52, %37 : vector<1x16xi1>, vector<1x16xf32>
    %54 = vector.broadcast %49 : i32 to vector<1x16xi32>
    %55 = arith.cmpi eq, %26, %54 : vector<1x16xi32>
    %cst_11 = arith.constant 1.000000e+00 : f32
    %56 = vector.broadcast %cst_11 : f32 to vector<1x16xf32>
    %57 = arith.select %55, %56, %31 : vector<1x16xi1>, vector<1x16xf32>
    %58 = vector.broadcast %49 : i32 to vector<16x16xi32>
    %59 = arith.cmpi eq, %27, %58 : vector<16x16xi32>
    %cst_12 = arith.constant 0.000000e+00 : f32
    %60 = vector.broadcast %cst_12 : f32 to vector<16x16xf32>
    %61 = arith.select %59, %25, %60 : vector<16x16xi1>, vector<16x16xf32>
    %cst_13 = arith.constant dense<0.000000e+00> : vector<16xf32>
    %62 = vector.multi_reduction <add>, %61, %cst_13 [0] : vector<16x16xf32> to vector<16xf32>
    %63 = vector.shape_cast %62 : vector<16xf32> to vector<1x16xf32>
    %cst_14 = arith.constant 5.000000e-01 : f32
    %64 = vector.broadcast %cst_14 : f32 to vector<1x16xf32>
    %65 = arith.cmpf ogt, %57, %64 : vector<1x16xf32>
    %66 = arith.minimumf %36, %63 : vector<1x16xf32>
    %cst_15 = arith.constant 1.000000e+30 : f32
    %67 = vector.broadcast %cst_15 : f32 to vector<1x16xf32>
    %68 = arith.select %65, %67, %66 : vector<1x16xi1>, vector<1x16xf32>
    %c1_i32 = arith.constant 1 : i32
    %69 = vector.shape_cast %68 : vector<1x16xf32> to vector<1x1x16xf32>
    %cst_16 = arith.constant dense<0x7F800000> : vector<1xf32>
    %70 = vector.multi_reduction <minimumf>, %69, %cst_16 [1, 2] : vector<1x1x16xf32> to vector<1xf32>
    %71 = vector.shape_cast %70 : vector<1xf32> to vector<1x1x1xf32>
    %72 = vector.extract %71[0, 0, 0] : f32 from vector<1x1x1xf32>
    %73 = vector.broadcast %72 : f32 to vector<1x16xf32>
    %74 = arith.cmpf oeq, %68, %73 : vector<1x16xf32>
    %c16_i32_17 = arith.constant 16 : i32
    %75 = vector.broadcast %c16_i32_17 : i32 to vector<1x16xi32>
    %76 = arith.select %74, %26, %75 : vector<1x16xi1>, vector<1x16xi32>
    %77 = vector.shape_cast %76 : vector<1x16xi32> to vector<1x1x16xi32>
    %cst_18 = arith.constant dense<2147483647> : vector<1xi32>
    %78 = vector.multi_reduction <minsi>, %77, %cst_18 [1, 2] : vector<1x1x16xi32> to vector<1xi32>
    %79 = vector.shape_cast %78 : vector<1xi32> to vector<1x1x1xi32>
    %80 = vector.extract %79[0, 0, 0] : i32 from vector<1x1x1xi32>
    %81 = vector.broadcast %c1_i32 : i32 to vector<1x16xi32>
    %82 = arith.cmpi eq, %26, %81 : vector<1x16xi32>
    %83 = vector.broadcast %72 : f32 to vector<1x16xf32>
    %84 = arith.select %82, %83, %53 : vector<1x16xi1>, vector<1x16xf32>
    %85 = vector.broadcast %80 : i32 to vector<1x16xi32>
    %86 = arith.cmpi eq, %26, %85 : vector<1x16xi32>
    %cst_19 = arith.constant 1.000000e+00 : f32
    %87 = vector.broadcast %cst_19 : f32 to vector<1x16xf32>
    %88 = arith.select %86, %87, %57 : vector<1x16xi1>, vector<1x16xf32>
    %89 = vector.broadcast %80 : i32 to vector<16x16xi32>
    %90 = arith.cmpi eq, %27, %89 : vector<16x16xi32>
    %cst_20 = arith.constant 0.000000e+00 : f32
    %91 = vector.broadcast %cst_20 : f32 to vector<16x16xf32>
    %92 = arith.select %90, %25, %91 : vector<16x16xi1>, vector<16x16xf32>
    %cst_21 = arith.constant dense<0.000000e+00> : vector<16xf32>
    %93 = vector.multi_reduction <add>, %92, %cst_21 [0] : vector<16x16xf32> to vector<16xf32>
    %94 = vector.shape_cast %93 : vector<16xf32> to vector<1x16xf32>
    %cst_22 = arith.constant 5.000000e-01 : f32
    %95 = vector.broadcast %cst_22 : f32 to vector<1x16xf32>
    %96 = arith.cmpf ogt, %88, %95 : vector<1x16xf32>
    %97 = arith.minimumf %68, %94 : vector<1x16xf32>
    %cst_23 = arith.constant 1.000000e+30 : f32
    %98 = vector.broadcast %cst_23 : f32 to vector<1x16xf32>
    %99 = arith.select %96, %98, %97 : vector<1x16xi1>, vector<1x16xf32>
    %c2_i32 = arith.constant 2 : i32
    %100 = vector.shape_cast %99 : vector<1x16xf32> to vector<1x1x16xf32>
    %cst_24 = arith.constant dense<0x7F800000> : vector<1xf32>
    %101 = vector.multi_reduction <minimumf>, %100, %cst_24 [1, 2] : vector<1x1x16xf32> to vector<1xf32>
    %102 = vector.shape_cast %101 : vector<1xf32> to vector<1x1x1xf32>
    %103 = vector.extract %102[0, 0, 0] : f32 from vector<1x1x1xf32>
    %104 = vector.broadcast %103 : f32 to vector<1x16xf32>
    %105 = arith.cmpf oeq, %99, %104 : vector<1x16xf32>
    %c16_i32_25 = arith.constant 16 : i32
    %106 = vector.broadcast %c16_i32_25 : i32 to vector<1x16xi32>
    %107 = arith.select %105, %26, %106 : vector<1x16xi1>, vector<1x16xi32>
    %108 = vector.shape_cast %107 : vector<1x16xi32> to vector<1x1x16xi32>
    %cst_26 = arith.constant dense<2147483647> : vector<1xi32>
    %109 = vector.multi_reduction <minsi>, %108, %cst_26 [1, 2] : vector<1x1x16xi32> to vector<1xi32>
    %110 = vector.shape_cast %109 : vector<1xi32> to vector<1x1x1xi32>
    %111 = vector.extract %110[0, 0, 0] : i32 from vector<1x1x1xi32>
    %112 = vector.broadcast %c2_i32 : i32 to vector<1x16xi32>
    %113 = arith.cmpi eq, %26, %112 : vector<1x16xi32>
    %114 = vector.broadcast %103 : f32 to vector<1x16xf32>
    %115 = arith.select %113, %114, %84 : vector<1x16xi1>, vector<1x16xf32>
    %116 = vector.broadcast %111 : i32 to vector<1x16xi32>
    %117 = arith.cmpi eq, %26, %116 : vector<1x16xi32>
    %cst_27 = arith.constant 1.000000e+00 : f32
    %118 = vector.broadcast %cst_27 : f32 to vector<1x16xf32>
    %119 = arith.select %117, %118, %88 : vector<1x16xi1>, vector<1x16xf32>
    %120 = vector.broadcast %111 : i32 to vector<16x16xi32>
    %121 = arith.cmpi eq, %27, %120 : vector<16x16xi32>
    %cst_28 = arith.constant 0.000000e+00 : f32
    %122 = vector.broadcast %cst_28 : f32 to vector<16x16xf32>
    %123 = arith.select %121, %25, %122 : vector<16x16xi1>, vector<16x16xf32>
    %cst_29 = arith.constant dense<0.000000e+00> : vector<16xf32>
    %124 = vector.multi_reduction <add>, %123, %cst_29 [0] : vector<16x16xf32> to vector<16xf32>
    %125 = vector.shape_cast %124 : vector<16xf32> to vector<1x16xf32>
    %cst_30 = arith.constant 5.000000e-01 : f32
    %126 = vector.broadcast %cst_30 : f32 to vector<1x16xf32>
    %127 = arith.cmpf ogt, %119, %126 : vector<1x16xf32>
    %128 = arith.minimumf %99, %125 : vector<1x16xf32>
    %cst_31 = arith.constant 1.000000e+30 : f32
    %129 = vector.broadcast %cst_31 : f32 to vector<1x16xf32>
    %130 = arith.select %127, %129, %128 : vector<1x16xi1>, vector<1x16xf32>
    %c3_i32 = arith.constant 3 : i32
    %131 = vector.shape_cast %130 : vector<1x16xf32> to vector<1x1x16xf32>
    %cst_32 = arith.constant dense<0x7F800000> : vector<1xf32>
    %132 = vector.multi_reduction <minimumf>, %131, %cst_32 [1, 2] : vector<1x1x16xf32> to vector<1xf32>
    %133 = vector.shape_cast %132 : vector<1xf32> to vector<1x1x1xf32>
    %134 = vector.extract %133[0, 0, 0] : f32 from vector<1x1x1xf32>
    %135 = vector.broadcast %134 : f32 to vector<1x16xf32>
    %136 = arith.cmpf oeq, %130, %135 : vector<1x16xf32>
    %c16_i32_33 = arith.constant 16 : i32
    %137 = vector.broadcast %c16_i32_33 : i32 to vector<1x16xi32>
    %138 = arith.select %136, %26, %137 : vector<1x16xi1>, vector<1x16xi32>
    %139 = vector.shape_cast %138 : vector<1x16xi32> to vector<1x1x16xi32>
    %cst_34 = arith.constant dense<2147483647> : vector<1xi32>
    %140 = vector.multi_reduction <minsi>, %139, %cst_34 [1, 2] : vector<1x1x16xi32> to vector<1xi32>
    %141 = vector.shape_cast %140 : vector<1xi32> to vector<1x1x1xi32>
    %142 = vector.extract %141[0, 0, 0] : i32 from vector<1x1x1xi32>
    %143 = vector.broadcast %c3_i32 : i32 to vector<1x16xi32>
    %144 = arith.cmpi eq, %26, %143 : vector<1x16xi32>
    %145 = vector.broadcast %134 : f32 to vector<1x16xf32>
    %146 = arith.select %144, %145, %115 : vector<1x16xi1>, vector<1x16xf32>
    %147 = vector.broadcast %142 : i32 to vector<1x16xi32>
    %148 = arith.cmpi eq, %26, %147 : vector<1x16xi32>
    %cst_35 = arith.constant 1.000000e+00 : f32
    %149 = vector.broadcast %cst_35 : f32 to vector<1x16xf32>
    %150 = arith.select %148, %149, %119 : vector<1x16xi1>, vector<1x16xf32>
    %151 = vector.broadcast %142 : i32 to vector<16x16xi32>
    %152 = arith.cmpi eq, %27, %151 : vector<16x16xi32>
    %cst_36 = arith.constant 0.000000e+00 : f32
    %153 = vector.broadcast %cst_36 : f32 to vector<16x16xf32>
    %154 = arith.select %152, %25, %153 : vector<16x16xi1>, vector<16x16xf32>
    %cst_37 = arith.constant dense<0.000000e+00> : vector<16xf32>
    %155 = vector.multi_reduction <add>, %154, %cst_37 [0] : vector<16x16xf32> to vector<16xf32>
    %156 = vector.shape_cast %155 : vector<16xf32> to vector<1x16xf32>
    %cst_38 = arith.constant 5.000000e-01 : f32
    %157 = vector.broadcast %cst_38 : f32 to vector<1x16xf32>
    %158 = arith.cmpf ogt, %150, %157 : vector<1x16xf32>
    %159 = arith.minimumf %130, %156 : vector<1x16xf32>
    %cst_39 = arith.constant 1.000000e+30 : f32
    %160 = vector.broadcast %cst_39 : f32 to vector<1x16xf32>
    %161 = arith.select %158, %160, %159 : vector<1x16xi1>, vector<1x16xf32>
    %c4_i32 = arith.constant 4 : i32
    %162 = vector.shape_cast %161 : vector<1x16xf32> to vector<1x1x16xf32>
    %cst_40 = arith.constant dense<0x7F800000> : vector<1xf32>
    %163 = vector.multi_reduction <minimumf>, %162, %cst_40 [1, 2] : vector<1x1x16xf32> to vector<1xf32>
    %164 = vector.shape_cast %163 : vector<1xf32> to vector<1x1x1xf32>
    %165 = vector.extract %164[0, 0, 0] : f32 from vector<1x1x1xf32>
    %166 = vector.broadcast %165 : f32 to vector<1x16xf32>
    %167 = arith.cmpf oeq, %161, %166 : vector<1x16xf32>
    %c16_i32_41 = arith.constant 16 : i32
    %168 = vector.broadcast %c16_i32_41 : i32 to vector<1x16xi32>
    %169 = arith.select %167, %26, %168 : vector<1x16xi1>, vector<1x16xi32>
    %170 = vector.shape_cast %169 : vector<1x16xi32> to vector<1x1x16xi32>
    %cst_42 = arith.constant dense<2147483647> : vector<1xi32>
    %171 = vector.multi_reduction <minsi>, %170, %cst_42 [1, 2] : vector<1x1x16xi32> to vector<1xi32>
    %172 = vector.shape_cast %171 : vector<1xi32> to vector<1x1x1xi32>
    %173 = vector.extract %172[0, 0, 0] : i32 from vector<1x1x1xi32>
    %174 = vector.broadcast %c4_i32 : i32 to vector<1x16xi32>
    %175 = arith.cmpi eq, %26, %174 : vector<1x16xi32>
    %176 = vector.broadcast %165 : f32 to vector<1x16xf32>
    %177 = arith.select %175, %176, %146 : vector<1x16xi1>, vector<1x16xf32>
    %178 = vector.broadcast %173 : i32 to vector<1x16xi32>
    %179 = arith.cmpi eq, %26, %178 : vector<1x16xi32>
    %cst_43 = arith.constant 1.000000e+00 : f32
    %180 = vector.broadcast %cst_43 : f32 to vector<1x16xf32>
    %181 = arith.select %179, %180, %150 : vector<1x16xi1>, vector<1x16xf32>
    %182 = vector.broadcast %173 : i32 to vector<16x16xi32>
    %183 = arith.cmpi eq, %27, %182 : vector<16x16xi32>
    %cst_44 = arith.constant 0.000000e+00 : f32
    %184 = vector.broadcast %cst_44 : f32 to vector<16x16xf32>
    %185 = arith.select %183, %25, %184 : vector<16x16xi1>, vector<16x16xf32>
    %cst_45 = arith.constant dense<0.000000e+00> : vector<16xf32>
    %186 = vector.multi_reduction <add>, %185, %cst_45 [0] : vector<16x16xf32> to vector<16xf32>
    %187 = vector.shape_cast %186 : vector<16xf32> to vector<1x16xf32>
    %cst_46 = arith.constant 5.000000e-01 : f32
    %188 = vector.broadcast %cst_46 : f32 to vector<1x16xf32>
    %189 = arith.cmpf ogt, %181, %188 : vector<1x16xf32>
    %190 = arith.minimumf %161, %187 : vector<1x16xf32>
    %cst_47 = arith.constant 1.000000e+30 : f32
    %191 = vector.broadcast %cst_47 : f32 to vector<1x16xf32>
    %192 = arith.select %189, %191, %190 : vector<1x16xi1>, vector<1x16xf32>
    %c5_i32 = arith.constant 5 : i32
    %193 = vector.shape_cast %192 : vector<1x16xf32> to vector<1x1x16xf32>
    %cst_48 = arith.constant dense<0x7F800000> : vector<1xf32>
    %194 = vector.multi_reduction <minimumf>, %193, %cst_48 [1, 2] : vector<1x1x16xf32> to vector<1xf32>
    %195 = vector.shape_cast %194 : vector<1xf32> to vector<1x1x1xf32>
    %196 = vector.extract %195[0, 0, 0] : f32 from vector<1x1x1xf32>
    %197 = vector.broadcast %196 : f32 to vector<1x16xf32>
    %198 = arith.cmpf oeq, %192, %197 : vector<1x16xf32>
    %c16_i32_49 = arith.constant 16 : i32
    %199 = vector.broadcast %c16_i32_49 : i32 to vector<1x16xi32>
    %200 = arith.select %198, %26, %199 : vector<1x16xi1>, vector<1x16xi32>
    %201 = vector.shape_cast %200 : vector<1x16xi32> to vector<1x1x16xi32>
    %cst_50 = arith.constant dense<2147483647> : vector<1xi32>
    %202 = vector.multi_reduction <minsi>, %201, %cst_50 [1, 2] : vector<1x1x16xi32> to vector<1xi32>
    %203 = vector.shape_cast %202 : vector<1xi32> to vector<1x1x1xi32>
    %204 = vector.extract %203[0, 0, 0] : i32 from vector<1x1x1xi32>
    %205 = vector.broadcast %c5_i32 : i32 to vector<1x16xi32>
    %206 = arith.cmpi eq, %26, %205 : vector<1x16xi32>
    %207 = vector.broadcast %196 : f32 to vector<1x16xf32>
    %208 = arith.select %206, %207, %177 : vector<1x16xi1>, vector<1x16xf32>
    %209 = vector.broadcast %204 : i32 to vector<1x16xi32>
    %210 = arith.cmpi eq, %26, %209 : vector<1x16xi32>
    %cst_51 = arith.constant 1.000000e+00 : f32
    %211 = vector.broadcast %cst_51 : f32 to vector<1x16xf32>
    %212 = arith.select %210, %211, %181 : vector<1x16xi1>, vector<1x16xf32>
    %213 = vector.broadcast %204 : i32 to vector<16x16xi32>
    %214 = arith.cmpi eq, %27, %213 : vector<16x16xi32>
    %cst_52 = arith.constant 0.000000e+00 : f32
    %215 = vector.broadcast %cst_52 : f32 to vector<16x16xf32>
    %216 = arith.select %214, %25, %215 : vector<16x16xi1>, vector<16x16xf32>
    %cst_53 = arith.constant dense<0.000000e+00> : vector<16xf32>
    %217 = vector.multi_reduction <add>, %216, %cst_53 [0] : vector<16x16xf32> to vector<16xf32>
    %218 = vector.shape_cast %217 : vector<16xf32> to vector<1x16xf32>
    %cst_54 = arith.constant 5.000000e-01 : f32
    %219 = vector.broadcast %cst_54 : f32 to vector<1x16xf32>
    %220 = arith.cmpf ogt, %212, %219 : vector<1x16xf32>
    %221 = arith.minimumf %192, %218 : vector<1x16xf32>
    %cst_55 = arith.constant 1.000000e+30 : f32
    %222 = vector.broadcast %cst_55 : f32 to vector<1x16xf32>
    %223 = arith.select %220, %222, %221 : vector<1x16xi1>, vector<1x16xf32>
    %c6_i32 = arith.constant 6 : i32
    %224 = vector.shape_cast %223 : vector<1x16xf32> to vector<1x1x16xf32>
    %cst_56 = arith.constant dense<0x7F800000> : vector<1xf32>
    %225 = vector.multi_reduction <minimumf>, %224, %cst_56 [1, 2] : vector<1x1x16xf32> to vector<1xf32>
    %226 = vector.shape_cast %225 : vector<1xf32> to vector<1x1x1xf32>
    %227 = vector.extract %226[0, 0, 0] : f32 from vector<1x1x1xf32>
    %228 = vector.broadcast %227 : f32 to vector<1x16xf32>
    %229 = arith.cmpf oeq, %223, %228 : vector<1x16xf32>
    %c16_i32_57 = arith.constant 16 : i32
    %230 = vector.broadcast %c16_i32_57 : i32 to vector<1x16xi32>
    %231 = arith.select %229, %26, %230 : vector<1x16xi1>, vector<1x16xi32>
    %232 = vector.shape_cast %231 : vector<1x16xi32> to vector<1x1x16xi32>
    %cst_58 = arith.constant dense<2147483647> : vector<1xi32>
    %233 = vector.multi_reduction <minsi>, %232, %cst_58 [1, 2] : vector<1x1x16xi32> to vector<1xi32>
    %234 = vector.shape_cast %233 : vector<1xi32> to vector<1x1x1xi32>
    %235 = vector.extract %234[0, 0, 0] : i32 from vector<1x1x1xi32>
    %236 = vector.broadcast %c6_i32 : i32 to vector<1x16xi32>
    %237 = arith.cmpi eq, %26, %236 : vector<1x16xi32>
    %238 = vector.broadcast %227 : f32 to vector<1x16xf32>
    %239 = arith.select %237, %238, %208 : vector<1x16xi1>, vector<1x16xf32>
    %240 = vector.broadcast %235 : i32 to vector<1x16xi32>
    %241 = arith.cmpi eq, %26, %240 : vector<1x16xi32>
    %cst_59 = arith.constant 1.000000e+00 : f32
    %242 = vector.broadcast %cst_59 : f32 to vector<1x16xf32>
    %243 = arith.select %241, %242, %212 : vector<1x16xi1>, vector<1x16xf32>
    %244 = vector.broadcast %235 : i32 to vector<16x16xi32>
    %245 = arith.cmpi eq, %27, %244 : vector<16x16xi32>
    %cst_60 = arith.constant 0.000000e+00 : f32
    %246 = vector.broadcast %cst_60 : f32 to vector<16x16xf32>
    %247 = arith.select %245, %25, %246 : vector<16x16xi1>, vector<16x16xf32>
    %cst_61 = arith.constant dense<0.000000e+00> : vector<16xf32>
    %248 = vector.multi_reduction <add>, %247, %cst_61 [0] : vector<16x16xf32> to vector<16xf32>
    %249 = vector.shape_cast %248 : vector<16xf32> to vector<1x16xf32>
    %cst_62 = arith.constant 5.000000e-01 : f32
    %250 = vector.broadcast %cst_62 : f32 to vector<1x16xf32>
    %251 = arith.cmpf ogt, %243, %250 : vector<1x16xf32>
    %252 = arith.minimumf %223, %249 : vector<1x16xf32>
    %cst_63 = arith.constant 1.000000e+30 : f32
    %253 = vector.broadcast %cst_63 : f32 to vector<1x16xf32>
    %254 = arith.select %251, %253, %252 : vector<1x16xi1>, vector<1x16xf32>
    %c7_i32 = arith.constant 7 : i32
    %255 = vector.shape_cast %254 : vector<1x16xf32> to vector<1x1x16xf32>
    %cst_64 = arith.constant dense<0x7F800000> : vector<1xf32>
    %256 = vector.multi_reduction <minimumf>, %255, %cst_64 [1, 2] : vector<1x1x16xf32> to vector<1xf32>
    %257 = vector.shape_cast %256 : vector<1xf32> to vector<1x1x1xf32>
    %258 = vector.extract %257[0, 0, 0] : f32 from vector<1x1x1xf32>
    %259 = vector.broadcast %258 : f32 to vector<1x16xf32>
    %260 = arith.cmpf oeq, %254, %259 : vector<1x16xf32>
    %c16_i32_65 = arith.constant 16 : i32
    %261 = vector.broadcast %c16_i32_65 : i32 to vector<1x16xi32>
    %262 = arith.select %260, %26, %261 : vector<1x16xi1>, vector<1x16xi32>
    %263 = vector.shape_cast %262 : vector<1x16xi32> to vector<1x1x16xi32>
    %cst_66 = arith.constant dense<2147483647> : vector<1xi32>
    %264 = vector.multi_reduction <minsi>, %263, %cst_66 [1, 2] : vector<1x1x16xi32> to vector<1xi32>
    %265 = vector.shape_cast %264 : vector<1xi32> to vector<1x1x1xi32>
    %266 = vector.extract %265[0, 0, 0] : i32 from vector<1x1x1xi32>
    %267 = vector.broadcast %c7_i32 : i32 to vector<1x16xi32>
    %268 = arith.cmpi eq, %26, %267 : vector<1x16xi32>
    %269 = vector.broadcast %258 : f32 to vector<1x16xf32>
    %270 = arith.select %268, %269, %239 : vector<1x16xi1>, vector<1x16xf32>
    %271 = vector.broadcast %266 : i32 to vector<1x16xi32>
    %272 = arith.cmpi eq, %26, %271 : vector<1x16xi32>
    %cst_67 = arith.constant 1.000000e+00 : f32
    %273 = vector.broadcast %cst_67 : f32 to vector<1x16xf32>
    %274 = arith.select %272, %273, %243 : vector<1x16xi1>, vector<1x16xf32>
    %275 = vector.broadcast %266 : i32 to vector<16x16xi32>
    %276 = arith.cmpi eq, %27, %275 : vector<16x16xi32>
    %cst_68 = arith.constant 0.000000e+00 : f32
    %277 = vector.broadcast %cst_68 : f32 to vector<16x16xf32>
    %278 = arith.select %276, %25, %277 : vector<16x16xi1>, vector<16x16xf32>
    %cst_69 = arith.constant dense<0.000000e+00> : vector<16xf32>
    %279 = vector.multi_reduction <add>, %278, %cst_69 [0] : vector<16x16xf32> to vector<16xf32>
    %280 = vector.shape_cast %279 : vector<16xf32> to vector<1x16xf32>
    %cst_70 = arith.constant 5.000000e-01 : f32
    %281 = vector.broadcast %cst_70 : f32 to vector<1x16xf32>
    %282 = arith.cmpf ogt, %274, %281 : vector<1x16xf32>
    %283 = arith.minimumf %254, %280 : vector<1x16xf32>
    %cst_71 = arith.constant 1.000000e+30 : f32
    %284 = vector.broadcast %cst_71 : f32 to vector<1x16xf32>
    %285 = arith.select %282, %284, %283 : vector<1x16xi1>, vector<1x16xf32>
    %c8_i32 = arith.constant 8 : i32
    %286 = vector.shape_cast %285 : vector<1x16xf32> to vector<1x1x16xf32>
    %cst_72 = arith.constant dense<0x7F800000> : vector<1xf32>
    %287 = vector.multi_reduction <minimumf>, %286, %cst_72 [1, 2] : vector<1x1x16xf32> to vector<1xf32>
    %288 = vector.shape_cast %287 : vector<1xf32> to vector<1x1x1xf32>
    %289 = vector.extract %288[0, 0, 0] : f32 from vector<1x1x1xf32>
    %290 = vector.broadcast %289 : f32 to vector<1x16xf32>
    %291 = arith.cmpf oeq, %285, %290 : vector<1x16xf32>
    %c16_i32_73 = arith.constant 16 : i32
    %292 = vector.broadcast %c16_i32_73 : i32 to vector<1x16xi32>
    %293 = arith.select %291, %26, %292 : vector<1x16xi1>, vector<1x16xi32>
    %294 = vector.shape_cast %293 : vector<1x16xi32> to vector<1x1x16xi32>
    %cst_74 = arith.constant dense<2147483647> : vector<1xi32>
    %295 = vector.multi_reduction <minsi>, %294, %cst_74 [1, 2] : vector<1x1x16xi32> to vector<1xi32>
    %296 = vector.shape_cast %295 : vector<1xi32> to vector<1x1x1xi32>
    %297 = vector.extract %296[0, 0, 0] : i32 from vector<1x1x1xi32>
    %298 = vector.broadcast %c8_i32 : i32 to vector<1x16xi32>
    %299 = arith.cmpi eq, %26, %298 : vector<1x16xi32>
    %300 = vector.broadcast %289 : f32 to vector<1x16xf32>
    %301 = arith.select %299, %300, %270 : vector<1x16xi1>, vector<1x16xf32>
    %302 = vector.broadcast %297 : i32 to vector<1x16xi32>
    %303 = arith.cmpi eq, %26, %302 : vector<1x16xi32>
    %cst_75 = arith.constant 1.000000e+00 : f32
    %304 = vector.broadcast %cst_75 : f32 to vector<1x16xf32>
    %305 = arith.select %303, %304, %274 : vector<1x16xi1>, vector<1x16xf32>
    %306 = vector.broadcast %297 : i32 to vector<16x16xi32>
    %307 = arith.cmpi eq, %27, %306 : vector<16x16xi32>
    %cst_76 = arith.constant 0.000000e+00 : f32
    %308 = vector.broadcast %cst_76 : f32 to vector<16x16xf32>
    %309 = arith.select %307, %25, %308 : vector<16x16xi1>, vector<16x16xf32>
    %cst_77 = arith.constant dense<0.000000e+00> : vector<16xf32>
    %310 = vector.multi_reduction <add>, %309, %cst_77 [0] : vector<16x16xf32> to vector<16xf32>
    %311 = vector.shape_cast %310 : vector<16xf32> to vector<1x16xf32>
    %cst_78 = arith.constant 5.000000e-01 : f32
    %312 = vector.broadcast %cst_78 : f32 to vector<1x16xf32>
    %313 = arith.cmpf ogt, %305, %312 : vector<1x16xf32>
    %314 = arith.minimumf %285, %311 : vector<1x16xf32>
    %cst_79 = arith.constant 1.000000e+30 : f32
    %315 = vector.broadcast %cst_79 : f32 to vector<1x16xf32>
    %316 = arith.select %313, %315, %314 : vector<1x16xi1>, vector<1x16xf32>
    %c9_i32 = arith.constant 9 : i32
    %317 = vector.shape_cast %316 : vector<1x16xf32> to vector<1x1x16xf32>
    %cst_80 = arith.constant dense<0x7F800000> : vector<1xf32>
    %318 = vector.multi_reduction <minimumf>, %317, %cst_80 [1, 2] : vector<1x1x16xf32> to vector<1xf32>
    %319 = vector.shape_cast %318 : vector<1xf32> to vector<1x1x1xf32>
    %320 = vector.extract %319[0, 0, 0] : f32 from vector<1x1x1xf32>
    %321 = vector.broadcast %320 : f32 to vector<1x16xf32>
    %322 = arith.cmpf oeq, %316, %321 : vector<1x16xf32>
    %c16_i32_81 = arith.constant 16 : i32
    %323 = vector.broadcast %c16_i32_81 : i32 to vector<1x16xi32>
    %324 = arith.select %322, %26, %323 : vector<1x16xi1>, vector<1x16xi32>
    %325 = vector.shape_cast %324 : vector<1x16xi32> to vector<1x1x16xi32>
    %cst_82 = arith.constant dense<2147483647> : vector<1xi32>
    %326 = vector.multi_reduction <minsi>, %325, %cst_82 [1, 2] : vector<1x1x16xi32> to vector<1xi32>
    %327 = vector.shape_cast %326 : vector<1xi32> to vector<1x1x1xi32>
    %328 = vector.extract %327[0, 0, 0] : i32 from vector<1x1x1xi32>
    %329 = vector.broadcast %c9_i32 : i32 to vector<1x16xi32>
    %330 = arith.cmpi eq, %26, %329 : vector<1x16xi32>
    %331 = vector.broadcast %320 : f32 to vector<1x16xf32>
    %332 = arith.select %330, %331, %301 : vector<1x16xi1>, vector<1x16xf32>
    %333 = vector.broadcast %328 : i32 to vector<1x16xi32>
    %334 = arith.cmpi eq, %26, %333 : vector<1x16xi32>
    %cst_83 = arith.constant 1.000000e+00 : f32
    %335 = vector.broadcast %cst_83 : f32 to vector<1x16xf32>
    %336 = arith.select %334, %335, %305 : vector<1x16xi1>, vector<1x16xf32>
    %337 = vector.broadcast %328 : i32 to vector<16x16xi32>
    %338 = arith.cmpi eq, %27, %337 : vector<16x16xi32>
    %cst_84 = arith.constant 0.000000e+00 : f32
    %339 = vector.broadcast %cst_84 : f32 to vector<16x16xf32>
    %340 = arith.select %338, %25, %339 : vector<16x16xi1>, vector<16x16xf32>
    %cst_85 = arith.constant dense<0.000000e+00> : vector<16xf32>
    %341 = vector.multi_reduction <add>, %340, %cst_85 [0] : vector<16x16xf32> to vector<16xf32>
    %342 = vector.shape_cast %341 : vector<16xf32> to vector<1x16xf32>
    %cst_86 = arith.constant 5.000000e-01 : f32
    %343 = vector.broadcast %cst_86 : f32 to vector<1x16xf32>
    %344 = arith.cmpf ogt, %336, %343 : vector<1x16xf32>
    %345 = arith.minimumf %316, %342 : vector<1x16xf32>
    %cst_87 = arith.constant 1.000000e+30 : f32
    %346 = vector.broadcast %cst_87 : f32 to vector<1x16xf32>
    %347 = arith.select %344, %346, %345 : vector<1x16xi1>, vector<1x16xf32>
    %c10_i32 = arith.constant 10 : i32
    %348 = vector.shape_cast %347 : vector<1x16xf32> to vector<1x1x16xf32>
    %cst_88 = arith.constant dense<0x7F800000> : vector<1xf32>
    %349 = vector.multi_reduction <minimumf>, %348, %cst_88 [1, 2] : vector<1x1x16xf32> to vector<1xf32>
    %350 = vector.shape_cast %349 : vector<1xf32> to vector<1x1x1xf32>
    %351 = vector.extract %350[0, 0, 0] : f32 from vector<1x1x1xf32>
    %352 = vector.broadcast %351 : f32 to vector<1x16xf32>
    %353 = arith.cmpf oeq, %347, %352 : vector<1x16xf32>
    %c16_i32_89 = arith.constant 16 : i32
    %354 = vector.broadcast %c16_i32_89 : i32 to vector<1x16xi32>
    %355 = arith.select %353, %26, %354 : vector<1x16xi1>, vector<1x16xi32>
    %356 = vector.shape_cast %355 : vector<1x16xi32> to vector<1x1x16xi32>
    %cst_90 = arith.constant dense<2147483647> : vector<1xi32>
    %357 = vector.multi_reduction <minsi>, %356, %cst_90 [1, 2] : vector<1x1x16xi32> to vector<1xi32>
    %358 = vector.shape_cast %357 : vector<1xi32> to vector<1x1x1xi32>
    %359 = vector.extract %358[0, 0, 0] : i32 from vector<1x1x1xi32>
    %360 = vector.broadcast %c10_i32 : i32 to vector<1x16xi32>
    %361 = arith.cmpi eq, %26, %360 : vector<1x16xi32>
    %362 = vector.broadcast %351 : f32 to vector<1x16xf32>
    %363 = arith.select %361, %362, %332 : vector<1x16xi1>, vector<1x16xf32>
    %364 = vector.broadcast %359 : i32 to vector<1x16xi32>
    %365 = arith.cmpi eq, %26, %364 : vector<1x16xi32>
    %cst_91 = arith.constant 1.000000e+00 : f32
    %366 = vector.broadcast %cst_91 : f32 to vector<1x16xf32>
    %367 = arith.select %365, %366, %336 : vector<1x16xi1>, vector<1x16xf32>
    %368 = vector.broadcast %359 : i32 to vector<16x16xi32>
    %369 = arith.cmpi eq, %27, %368 : vector<16x16xi32>
    %cst_92 = arith.constant 0.000000e+00 : f32
    %370 = vector.broadcast %cst_92 : f32 to vector<16x16xf32>
    %371 = arith.select %369, %25, %370 : vector<16x16xi1>, vector<16x16xf32>
    %cst_93 = arith.constant dense<0.000000e+00> : vector<16xf32>
    %372 = vector.multi_reduction <add>, %371, %cst_93 [0] : vector<16x16xf32> to vector<16xf32>
    %373 = vector.shape_cast %372 : vector<16xf32> to vector<1x16xf32>
    %cst_94 = arith.constant 5.000000e-01 : f32
    %374 = vector.broadcast %cst_94 : f32 to vector<1x16xf32>
    %375 = arith.cmpf ogt, %367, %374 : vector<1x16xf32>
    %376 = arith.minimumf %347, %373 : vector<1x16xf32>
    %cst_95 = arith.constant 1.000000e+30 : f32
    %377 = vector.broadcast %cst_95 : f32 to vector<1x16xf32>
    %378 = arith.select %375, %377, %376 : vector<1x16xi1>, vector<1x16xf32>
    %c11_i32 = arith.constant 11 : i32
    %379 = vector.shape_cast %378 : vector<1x16xf32> to vector<1x1x16xf32>
    %cst_96 = arith.constant dense<0x7F800000> : vector<1xf32>
    %380 = vector.multi_reduction <minimumf>, %379, %cst_96 [1, 2] : vector<1x1x16xf32> to vector<1xf32>
    %381 = vector.shape_cast %380 : vector<1xf32> to vector<1x1x1xf32>
    %382 = vector.extract %381[0, 0, 0] : f32 from vector<1x1x1xf32>
    %383 = vector.broadcast %382 : f32 to vector<1x16xf32>
    %384 = arith.cmpf oeq, %378, %383 : vector<1x16xf32>
    %c16_i32_97 = arith.constant 16 : i32
    %385 = vector.broadcast %c16_i32_97 : i32 to vector<1x16xi32>
    %386 = arith.select %384, %26, %385 : vector<1x16xi1>, vector<1x16xi32>
    %387 = vector.shape_cast %386 : vector<1x16xi32> to vector<1x1x16xi32>
    %cst_98 = arith.constant dense<2147483647> : vector<1xi32>
    %388 = vector.multi_reduction <minsi>, %387, %cst_98 [1, 2] : vector<1x1x16xi32> to vector<1xi32>
    %389 = vector.shape_cast %388 : vector<1xi32> to vector<1x1x1xi32>
    %390 = vector.extract %389[0, 0, 0] : i32 from vector<1x1x1xi32>
    %391 = vector.broadcast %c11_i32 : i32 to vector<1x16xi32>
    %392 = arith.cmpi eq, %26, %391 : vector<1x16xi32>
    %393 = vector.broadcast %382 : f32 to vector<1x16xf32>
    %394 = arith.select %392, %393, %363 : vector<1x16xi1>, vector<1x16xf32>
    %395 = vector.broadcast %390 : i32 to vector<1x16xi32>
    %396 = arith.cmpi eq, %26, %395 : vector<1x16xi32>
    %cst_99 = arith.constant 1.000000e+00 : f32
    %397 = vector.broadcast %cst_99 : f32 to vector<1x16xf32>
    %398 = arith.select %396, %397, %367 : vector<1x16xi1>, vector<1x16xf32>
    %399 = vector.broadcast %390 : i32 to vector<16x16xi32>
    %400 = arith.cmpi eq, %27, %399 : vector<16x16xi32>
    %cst_100 = arith.constant 0.000000e+00 : f32
    %401 = vector.broadcast %cst_100 : f32 to vector<16x16xf32>
    %402 = arith.select %400, %25, %401 : vector<16x16xi1>, vector<16x16xf32>
    %cst_101 = arith.constant dense<0.000000e+00> : vector<16xf32>
    %403 = vector.multi_reduction <add>, %402, %cst_101 [0] : vector<16x16xf32> to vector<16xf32>
    %404 = vector.shape_cast %403 : vector<16xf32> to vector<1x16xf32>
    %cst_102 = arith.constant 5.000000e-01 : f32
    %405 = vector.broadcast %cst_102 : f32 to vector<1x16xf32>
    %406 = arith.cmpf ogt, %398, %405 : vector<1x16xf32>
    %407 = arith.minimumf %378, %404 : vector<1x16xf32>
    %cst_103 = arith.constant 1.000000e+30 : f32
    %408 = vector.broadcast %cst_103 : f32 to vector<1x16xf32>
    %409 = arith.select %406, %408, %407 : vector<1x16xi1>, vector<1x16xf32>
    %c12_i32 = arith.constant 12 : i32
    %410 = vector.shape_cast %409 : vector<1x16xf32> to vector<1x1x16xf32>
    %cst_104 = arith.constant dense<0x7F800000> : vector<1xf32>
    %411 = vector.multi_reduction <minimumf>, %410, %cst_104 [1, 2] : vector<1x1x16xf32> to vector<1xf32>
    %412 = vector.shape_cast %411 : vector<1xf32> to vector<1x1x1xf32>
    %413 = vector.extract %412[0, 0, 0] : f32 from vector<1x1x1xf32>
    %414 = vector.broadcast %413 : f32 to vector<1x16xf32>
    %415 = arith.cmpf oeq, %409, %414 : vector<1x16xf32>
    %c16_i32_105 = arith.constant 16 : i32
    %416 = vector.broadcast %c16_i32_105 : i32 to vector<1x16xi32>
    %417 = arith.select %415, %26, %416 : vector<1x16xi1>, vector<1x16xi32>
    %418 = vector.shape_cast %417 : vector<1x16xi32> to vector<1x1x16xi32>
    %cst_106 = arith.constant dense<2147483647> : vector<1xi32>
    %419 = vector.multi_reduction <minsi>, %418, %cst_106 [1, 2] : vector<1x1x16xi32> to vector<1xi32>
    %420 = vector.shape_cast %419 : vector<1xi32> to vector<1x1x1xi32>
    %421 = vector.extract %420[0, 0, 0] : i32 from vector<1x1x1xi32>
    %422 = vector.broadcast %c12_i32 : i32 to vector<1x16xi32>
    %423 = arith.cmpi eq, %26, %422 : vector<1x16xi32>
    %424 = vector.broadcast %413 : f32 to vector<1x16xf32>
    %425 = arith.select %423, %424, %394 : vector<1x16xi1>, vector<1x16xf32>
    %426 = vector.broadcast %421 : i32 to vector<1x16xi32>
    %427 = arith.cmpi eq, %26, %426 : vector<1x16xi32>
    %cst_107 = arith.constant 1.000000e+00 : f32
    %428 = vector.broadcast %cst_107 : f32 to vector<1x16xf32>
    %429 = arith.select %427, %428, %398 : vector<1x16xi1>, vector<1x16xf32>
    %430 = vector.broadcast %421 : i32 to vector<16x16xi32>
    %431 = arith.cmpi eq, %27, %430 : vector<16x16xi32>
    %cst_108 = arith.constant 0.000000e+00 : f32
    %432 = vector.broadcast %cst_108 : f32 to vector<16x16xf32>
    %433 = arith.select %431, %25, %432 : vector<16x16xi1>, vector<16x16xf32>
    %cst_109 = arith.constant dense<0.000000e+00> : vector<16xf32>
    %434 = vector.multi_reduction <add>, %433, %cst_109 [0] : vector<16x16xf32> to vector<16xf32>
    %435 = vector.shape_cast %434 : vector<16xf32> to vector<1x16xf32>
    %cst_110 = arith.constant 5.000000e-01 : f32
    %436 = vector.broadcast %cst_110 : f32 to vector<1x16xf32>
    %437 = arith.cmpf ogt, %429, %436 : vector<1x16xf32>
    %438 = arith.minimumf %409, %435 : vector<1x16xf32>
    %cst_111 = arith.constant 1.000000e+30 : f32
    %439 = vector.broadcast %cst_111 : f32 to vector<1x16xf32>
    %440 = arith.select %437, %439, %438 : vector<1x16xi1>, vector<1x16xf32>
    %c13_i32 = arith.constant 13 : i32
    %441 = vector.shape_cast %440 : vector<1x16xf32> to vector<1x1x16xf32>
    %cst_112 = arith.constant dense<0x7F800000> : vector<1xf32>
    %442 = vector.multi_reduction <minimumf>, %441, %cst_112 [1, 2] : vector<1x1x16xf32> to vector<1xf32>
    %443 = vector.shape_cast %442 : vector<1xf32> to vector<1x1x1xf32>
    %444 = vector.extract %443[0, 0, 0] : f32 from vector<1x1x1xf32>
    %445 = vector.broadcast %444 : f32 to vector<1x16xf32>
    %446 = arith.cmpf oeq, %440, %445 : vector<1x16xf32>
    %c16_i32_113 = arith.constant 16 : i32
    %447 = vector.broadcast %c16_i32_113 : i32 to vector<1x16xi32>
    %448 = arith.select %446, %26, %447 : vector<1x16xi1>, vector<1x16xi32>
    %449 = vector.shape_cast %448 : vector<1x16xi32> to vector<1x1x16xi32>
    %cst_114 = arith.constant dense<2147483647> : vector<1xi32>
    %450 = vector.multi_reduction <minsi>, %449, %cst_114 [1, 2] : vector<1x1x16xi32> to vector<1xi32>
    %451 = vector.shape_cast %450 : vector<1xi32> to vector<1x1x1xi32>
    %452 = vector.extract %451[0, 0, 0] : i32 from vector<1x1x1xi32>
    %453 = vector.broadcast %c13_i32 : i32 to vector<1x16xi32>
    %454 = arith.cmpi eq, %26, %453 : vector<1x16xi32>
    %455 = vector.broadcast %444 : f32 to vector<1x16xf32>
    %456 = arith.select %454, %455, %425 : vector<1x16xi1>, vector<1x16xf32>
    %457 = vector.broadcast %452 : i32 to vector<1x16xi32>
    %458 = arith.cmpi eq, %26, %457 : vector<1x16xi32>
    %cst_115 = arith.constant 1.000000e+00 : f32
    %459 = vector.broadcast %cst_115 : f32 to vector<1x16xf32>
    %460 = arith.select %458, %459, %429 : vector<1x16xi1>, vector<1x16xf32>
    %461 = vector.broadcast %452 : i32 to vector<16x16xi32>
    %462 = arith.cmpi eq, %27, %461 : vector<16x16xi32>
    %cst_116 = arith.constant 0.000000e+00 : f32
    %463 = vector.broadcast %cst_116 : f32 to vector<16x16xf32>
    %464 = arith.select %462, %25, %463 : vector<16x16xi1>, vector<16x16xf32>
    %cst_117 = arith.constant dense<0.000000e+00> : vector<16xf32>
    %465 = vector.multi_reduction <add>, %464, %cst_117 [0] : vector<16x16xf32> to vector<16xf32>
    %466 = vector.shape_cast %465 : vector<16xf32> to vector<1x16xf32>
    %cst_118 = arith.constant 5.000000e-01 : f32
    %467 = vector.broadcast %cst_118 : f32 to vector<1x16xf32>
    %468 = arith.cmpf ogt, %460, %467 : vector<1x16xf32>
    %469 = arith.minimumf %440, %466 : vector<1x16xf32>
    %cst_119 = arith.constant 1.000000e+30 : f32
    %470 = vector.broadcast %cst_119 : f32 to vector<1x16xf32>
    %471 = arith.select %468, %470, %469 : vector<1x16xi1>, vector<1x16xf32>
    %c14_i32 = arith.constant 14 : i32
    %472 = vector.shape_cast %471 : vector<1x16xf32> to vector<1x1x16xf32>
    %cst_120 = arith.constant dense<0x7F800000> : vector<1xf32>
    %473 = vector.multi_reduction <minimumf>, %472, %cst_120 [1, 2] : vector<1x1x16xf32> to vector<1xf32>
    %474 = vector.shape_cast %473 : vector<1xf32> to vector<1x1x1xf32>
    %475 = vector.extract %474[0, 0, 0] : f32 from vector<1x1x1xf32>
    %476 = vector.broadcast %475 : f32 to vector<1x16xf32>
    %477 = arith.cmpf oeq, %471, %476 : vector<1x16xf32>
    %c16_i32_121 = arith.constant 16 : i32
    %478 = vector.broadcast %c16_i32_121 : i32 to vector<1x16xi32>
    %479 = arith.select %477, %26, %478 : vector<1x16xi1>, vector<1x16xi32>
    %480 = vector.shape_cast %479 : vector<1x16xi32> to vector<1x1x16xi32>
    %cst_122 = arith.constant dense<2147483647> : vector<1xi32>
    %481 = vector.multi_reduction <minsi>, %480, %cst_122 [1, 2] : vector<1x1x16xi32> to vector<1xi32>
    %482 = vector.shape_cast %481 : vector<1xi32> to vector<1x1x1xi32>
    %483 = vector.extract %482[0, 0, 0] : i32 from vector<1x1x1xi32>
    %484 = vector.broadcast %c14_i32 : i32 to vector<1x16xi32>
    %485 = arith.cmpi eq, %26, %484 : vector<1x16xi32>
    %486 = vector.broadcast %475 : f32 to vector<1x16xf32>
    %487 = arith.select %485, %486, %456 : vector<1x16xi1>, vector<1x16xf32>
    %488 = vector.broadcast %483 : i32 to vector<1x16xi32>
    %489 = arith.cmpi eq, %26, %488 : vector<1x16xi32>
    %cst_123 = arith.constant 1.000000e+00 : f32
    %490 = vector.broadcast %cst_123 : f32 to vector<1x16xf32>
    %491 = arith.select %489, %490, %460 : vector<1x16xi1>, vector<1x16xf32>
    %492 = vector.broadcast %483 : i32 to vector<16x16xi32>
    %493 = arith.cmpi eq, %27, %492 : vector<16x16xi32>
    %cst_124 = arith.constant 0.000000e+00 : f32
    %494 = vector.broadcast %cst_124 : f32 to vector<16x16xf32>
    %495 = arith.select %493, %25, %494 : vector<16x16xi1>, vector<16x16xf32>
    %cst_125 = arith.constant dense<0.000000e+00> : vector<16xf32>
    %496 = vector.multi_reduction <add>, %495, %cst_125 [0] : vector<16x16xf32> to vector<16xf32>
    %497 = vector.shape_cast %496 : vector<16xf32> to vector<1x16xf32>
    %cst_126 = arith.constant 5.000000e-01 : f32
    %498 = vector.broadcast %cst_126 : f32 to vector<1x16xf32>
    %499 = arith.cmpf ogt, %491, %498 : vector<1x16xf32>
    %500 = arith.minimumf %471, %497 : vector<1x16xf32>
    %cst_127 = arith.constant 1.000000e+30 : f32
    %501 = vector.broadcast %cst_127 : f32 to vector<1x16xf32>
    %502 = arith.select %499, %501, %500 : vector<1x16xi1>, vector<1x16xf32>
    %c15_i32 = arith.constant 15 : i32
    %503 = vector.extract_strided_slice %487 {offsets = [0, 0], sizes = [1, 15], strides = [1, 1]} : vector<1x16xf32> to vector<1x15xf32>
    %504 = math.sqrt %503 : vector<1x15xf32>
    %c0_128 = arith.constant 0 : index
    %c0_129 = arith.constant 0 : index
    %505 = vector.load %arg4[%c0_128, %c0_129] : memref<8x1xf32, #tpu.memory_space<vmem>>, vector<8x1xf32>
    %506 = vector.broadcast %505 : vector<8x1xf32> to vector<8x15xf32>
    %507 = vector.broadcast %504 : vector<1x15xf32> to vector<8x15xf32>
    %508 = arith.subf %506, %507 : vector<8x15xf32>
    %c0_130 = arith.constant 0 : index
    %c0_131 = arith.constant 0 : index
    %509 = vector.load %arg3[%c0_130, %c0_131] : memref<8x1xf32, #tpu.memory_space<vmem>>, vector<8x1xf32>
    %c0_132 = arith.constant 0 : index
    %c0_133 = arith.constant 0 : index
    %510 = vector.load %arg5[%c0_132, %c0_133] : memref<8x1xf32, #tpu.memory_space<vmem>>, vector<8x1xf32>
    %511 = vector.broadcast %510 : vector<8x1xf32> to vector<8x15xf32>
    %512 = arith.mulf %511, %508 : vector<8x15xf32>
    %513 = arith.mulf %512, %508 : vector<8x15xf32>
    %514 = vector.broadcast %509 : vector<8x1xf32> to vector<8x15xf32>
    %515 = arith.addf %514, %513 : vector<8x15xf32>
    %cst_134 = arith.constant 0.000000e+00 : f32
    %516 = vector.broadcast %cst_134 : f32 to vector<8x15xf32>
    %517 = arith.subf %516, %515 : vector<8x15xf32>
    %518 = math.exp %517 : vector<8x15xf32>
    %cst_135 = arith.constant dense<0.000000e+00> : vector<8xf32>
    %519 = vector.multi_reduction <add>, %518, %cst_135 [1] : vector<8x15xf32> to vector<8xf32>
    %520 = vector.shape_cast %519 : vector<8xf32> to vector<8x1xf32>
    %c0_136 = arith.constant 0 : index
    %c0_137 = arith.constant 0 : index
    %521 = vector.load %arg6[%c0_136, %c0_137] : memref<32x8xf32, #tpu.memory_space<vmem>>, vector<32x8xf32>
    %cst_138 = arith.constant dense<0.000000e+00> : vector<32x1xf32>
    %522 = tpu.matmul %521, %520, %cst_138 {dimension_numbers = #tpu.dot_dimension_numbers<[1], [0], [0], [1], [0, 0, 1, 1], [], []>} : vector<32x8xf32>, vector<8x1xf32>, vector<32x1xf32> -> vector<32x1xf32>
    %c0_139 = arith.constant 0 : index
    %c0_140 = arith.constant 0 : index
    %523 = vector.load %arg7[%c0_139, %c0_140] : memref<32x1xf32, #tpu.memory_space<vmem>>, vector<32x1xf32>
    %524 = arith.addf %522, %523 : vector<32x1xf32>
    %cst_141 = arith.constant 0.000000e+00 : f32
    %525 = vector.broadcast %cst_141 : f32 to vector<32x1xf32>
    %526 = arith.maximumf %524, %525 : vector<32x1xf32>
    %c0_142 = arith.constant 0 : index
    %c0_143 = arith.constant 0 : index
    %527 = vector.load %arg8[%c0_142, %c0_143] : memref<2x32xf32, #tpu.memory_space<vmem>>, vector<2x32xf32>
    %cst_144 = arith.constant dense<0.000000e+00> : vector<2x1xf32>
    %528 = tpu.matmul %527, %526, %cst_144 {dimension_numbers = #tpu.dot_dimension_numbers<[1], [0], [0], [1], [0, 0, 1, 1], [], []>} : vector<2x32xf32>, vector<32x1xf32>, vector<2x1xf32> -> vector<2x1xf32>
    %c0_145 = arith.constant 0 : index
    %c0_146 = arith.constant 0 : index
    %529 = vector.load %arg9[%c0_145, %c0_146] : memref<2x1xf32, #tpu.memory_space<vmem>>, vector<2x1xf32>
    %530 = arith.addf %528, %529 : vector<2x1xf32>
    %c0_147 = arith.constant 0 : index
    %c0_148 = arith.constant 0 : index
    %c0_149 = arith.constant 0 : index
    %531 = vector.load %arg10[%c0_147, %c0_148, %c0_149] : memref<1x2x1xf32, #tpu.memory_space<vmem>>, vector<1x2x1xf32>
    %532 = vector.shape_cast %531 : vector<1x2x1xf32> to vector<2x1xf32>
    %533 = vector.shape_cast %530 : vector<2x1xf32> to vector<1x2x1xf32>
    tpu.vector_store %arg10[%c0_147, %c0_148, %c0_149], %533 {strides = array<i32>} : memref<1x2x1xf32, #tpu.memory_space<vmem>>, vector<1x2x1xf32>,
    return
  }
  func.func @transform_0(%arg0: i32) -> (i32, i32, i32) {
    %c0_i32 = arith.constant 0 : i32
    %c0_i32_0 = arith.constant 0 : i32
    %c0_i32_1 = arith.constant 0 : i32
    return %arg0, %c0_i32, %c0_i32_0 : i32, i32, i32
  }
  func.func @transform_1(%arg0: i32) -> (i32, i32, i32) {
    %c0_i32 = arith.constant 0 : i32
    %c0_i32_0 = arith.constant 0 : i32
    %c0_i32_1 = arith.constant 0 : i32
    return %arg0, %c0_i32, %c0_i32_0 : i32, i32, i32
  }
  func.func @transform_2(%arg0: i32) -> (i32, i32) {
    %c0_i32 = arith.constant 0 : i32
    %c0_i32_0 = arith.constant 0 : i32
    %c0_i32_1 = arith.constant 0 : i32
    return %c0_i32, %c0_i32_0 : i32, i32
  }
  func.func @transform_3(%arg0: i32) -> (i32, i32) {
    %c0_i32 = arith.constant 0 : i32
    %c0_i32_0 = arith.constant 0 : i32
    %c0_i32_1 = arith.constant 0 : i32
    return %c0_i32, %c0_i32_0 : i32, i32
  }
  func.func @transform_4(%arg0: i32) -> (i32, i32) {
    %c0_i32 = arith.constant 0 : i32
    %c0_i32_0 = arith.constant 0 : i32
    %c0_i32_1 = arith.constant 0 : i32
    return %c0_i32, %c0_i32_0 : i32, i32
  }
  func.func @transform_5(%arg0: i32) -> (i32, i32) {
    %c0_i32 = arith.constant 0 : i32
    %c0_i32_0 = arith.constant 0 : i32
    %c0_i32_1 = arith.constant 0 : i32
    return %c0_i32, %c0_i32_0 : i32, i32
  }
  func.func @transform_6(%arg0: i32) -> (i32, i32) {
    %c0_i32 = arith.constant 0 : i32
    %c0_i32_0 = arith.constant 0 : i32
    %c0_i32_1 = arith.constant 0 : i32
    return %c0_i32, %c0_i32_0 : i32, i32
  }
  func.func @transform_7(%arg0: i32) -> (i32, i32) {
    %c0_i32 = arith.constant 0 : i32
    %c0_i32_0 = arith.constant 0 : i32
    %c0_i32_1 = arith.constant 0 : i32
    return %c0_i32, %c0_i32_0 : i32, i32
  }
  func.func @transform_8(%arg0: i32) -> (i32, i32) {
    %c0_i32 = arith.constant 0 : i32
    %c0_i32_0 = arith.constant 0 : i32
    %c0_i32_1 = arith.constant 0 : i32
    return %c0_i32, %c0_i32_0 : i32, i32
  }
  func.func @transform_9(%arg0: i32) -> (i32, i32, i32) {
    %c0_i32 = arith.constant 0 : i32
    %c0_i32_0 = arith.constant 0 : i32
    %c0_i32_1 = arith.constant 0 : i32
    return %arg0, %c0_i32, %c0_i32_0 : i32, i32, i32
  }
}

</mosaic_0001>

<bundles_post_ra>
// kernel: square.1
= control target key start
LH: loop header
LB: loop body
LE: loop exit
PB: predicated region body
PF: predicated region fallthrough
CT: control target
= control target key end

     0   :  { %s34_s0 = inlined_call_operand.vmem [shape: f32[8,2], index: 0, kind: input, shape index: {}, may-alias: {0,1}]   ;;  %s35_s1 = inlined_call_operand.vmem [shape: f32[8,2], index: 1, kind: input, shape index: {}, may-alias: {0,1}]   ;;  %s36_s2 = inlined_call_operand.vmem [shape: f32[8,2], index: 2, kind: output, shape index: {}]  }
   0x1   :  { %v3_v0 = vld [vmem:[%s34_s0] sm:$0xff] }
   0x2   :  { %v4_v1 = vld [vmem:[%s35_s1] sm:$0xff] }
   0x3   :  { %v7_v2 = vmul.f32 %v4_v1, %v3_v0 }
   0x5   :  { %9 = vst [vmem:[%s36_s2] sm:$0xff] %v7_v2 }

// kernel: topological_model_forward.1
= control target key start
LH: loop header
LB: loop body
LE: loop exit
PB: predicated region body
PF: predicated region fallthrough
CT: control target
= control target key end

     0   :  { %s1745_s30 = smov 0   ;;  %s2034_s0 = inlined_call_operand.vmem [shape: f32[2,16,3], index: 0, kind: input, shape index: {}]   ;;  %s2035_s1 = inlined_call_operand.vmem [shape: f32[2,3,16], index: 1, kind: input, shape index: {}]   ;;  %s2036_s2 = inlined_call_operand.vmem [shape: f32[8,1], index: 2, kind: input, shape index: {}]   ;;  %s2037_s3 = inlined_call_operand.vmem [shape: f32[8,1], index: 3, kind: input, shape index: {}]   ;;  %s2038_s4 = inlined_call_operand.vmem [shape: f32[8,1], index: 4, kind: input, shape index: {}]   ;;  %s2039_s5 = inlined_call_operand.vmem [shape: f32[32,8], index: 5, kind: input, shape index: {}]   ;;  %s2040_s6 = inlined_call_operand.vmem [shape: f32[32,1], index: 6, kind: input, shape index: {}]   ;;  %s2041_s7 = inlined_call_operand.vmem [shape: f32[2,32], index: 7, kind: input, shape index: {}]   ;;  %s2042_s8 = inlined_call_operand.vmem [shape: f32[2,1], index: 8, kind: input, shape index: {}]   ;;  %s2043_s9 = inlined_call_operand.vmem [shape: f32[2,2,1], index: 9, kind: output, shape index: {}]  }
   0x1 LB: > { %s1545_s10 = sadd.s32 4294967295, %s1687_s30   ;;  %p1549_p0 = scmp.ge.s32.totalorder %s1687_s30, 1  ;;  %s1687_s30 = sphi %s1745_s30, %s19_s30  }
   0x2   : > { %p296_p1 = scmp.lt.s32.totalorder %s1687_s30, 3 }
   0x4   : > { %p297_p2 = pnand %p1549_p0, %p296_p1 }
   0x5   : > { %p335_p3 = scmp.lt.s32.totalorder (!%p297_p2), %s1545_s10, 1  ;;  %v1689_v0 = vmov (!%p297_p2), 0   ;;  %v1690_v1 = vmov (!%p297_p2), 2   ;;  %v1691_v3 = vmov (!%p297_p2), 1   ;;  %v361_v4 = vlaneseq (!%p297_p2) }
   0x6   : > { %300 = sbr.rel (%p297_p2) target bundleno = 9194 (0x23ea), region = 56  ;;  %1670 = vset.pattern.permute.xlu0 (!%p297_p2), %v1689_v0  ;;  %1672 = vset.pattern.permute.xlu1 (!%p297_p2), %v1690_v1  ;;  %vm416_vm1 = vcmask (!%p297_p2), 122880   ;;  %vm463_vm7 = vcmask (!%p297_p2), 130048  }
   0x7   : > { %v1766_v5 = vshrl.u32 (!%p297_p2), %v361_v4, 7  ;;  %v1780_v19 = vand.u32 (!%p297_p2), 127, %v361_v4 }
   0x9   : > { %v363_v6 = vsub.s32 (!%p297_p2), 0, %v1766_v5  ;;  %v399_v7 = vsub.s32 (!%p297_p2), 2, %v1766_v5  ;;  %v381_v9 = vsub.s32 (!%p297_p2), 1, %v1766_v5  ;;  %vm412_vm0 = vcmp.eq.s32.totalorder (!%p297_p2), %v1780_v19, 0 }
   0xa   : > { %vm514_vm12 = vcmp.eq.s32.totalorder (!%p297_p2), %v1780_v19, 1 }
   0xd   : > { %s2045_s10 = smov (!%p335_p3, %s1545_s10), 1 }
   0xe   : > { %s1562_s11 = sshll.u32 %s2045_s10, 4  ;;  %s1552_s15 = sshll.u32 %s2045_s10, 2 }
   0xf   : > { %s1761_s14 = scalar_lea.vmem %s2034_s0, %s1562_s11  ;;  %s343_s18 = scalar_lea.vmem %s2035_s1, %s1552_s15 }
  0x10   : > { %v348_v2 = vld [vmem:[%s1761_s14] sm:$0xff]  ;;  %v349_v39 = vld [vmem:[%s1761_s14 + $0x8] sm:$0xff] }
  0x11   : > { %353 = vperm.xlu0 %1670, %v348_v2   ;;  %390 = vperm.xlu1 %1672, %v348_v2   ;;  %v350_v8 = vld [vmem:[%s343_s18] sm:$0x7] }
  0x12   : > { %v1774_v10 = vrot.slane %v350_v8, %v363_v6  ;;  %v1776_v12 = vrot.slane %v350_v8, %v399_v7  ;;  %v382_v14 = vrot.slane %v350_v8, %v381_v9 }
  0x15   : > { %1671 = vset.pattern.permute.xlu0 %v1691_v3  ;;  %1674 = vset.pattern.permute.xlu1 %v1691_v3 }
  0x16   : > { %372 = vperm.xlu0 %1671, %v348_v2  }
  0x1a   : > { %1673 = vset.pattern.permute.xlu0 %v1689_v0 }
  0x90   : > { %v354_v11 = vpop.permute.xlu0 %353  ;;  %v391_v13 = vpop.permute.xlu1 %390 }
  0x91   : > { %v365_v15 = vsub.f32 %v354_v11, %v1774_v10  ;;  %v401_v16 = vsub.f32 %v391_v13, %v1776_v12 }
  0x93   : > { %v367_v20 = vmul.f32 %v365_v15, %v365_v15  ;;  %v403_v22 = vmul.f32 %v401_v16, %v401_v16 }
  0x95   : > { %v373_v17 = vpop.permute.xlu0 %372 }
  0x96   : > { %v383_v18 = vsub.f32 %v373_v17, %v382_v14 }
  0x98   : > { %v385_v21 = vmul.f32 %v383_v18, %v383_v18 }
  0x9a   : > { %v387_v23 = vadd.f32 %v385_v21, %v367_v20 }
  0x9c   : > { %v1783_v24 = vadd.f32 %v403_v22, %v387_v23 }
  0x9e   : > { %v1788_v25 = vsel %vm412_vm0, 1e+30, %v1783_v24 }
  0x9f   : > { %v417_v26 = vsel %vm416_vm1, %v1788_v25, inf }
  0xa0   : > { %418 = vmin.xlane.f32.xlu1 %v417_v26 }
 0x12d   : > { %v419_v27 = vpop.xlane.xlu1 %418 }
 0x12e   : > { %v420_v28 = vrot.slane %v419_v27, 4 }
 0x130   : > { %v421_v29 = vmin.f32 %v419_v27, %v420_v28 }
 0x132   : > { %v422_v30 = vrot.slane %v421_v29, 2 }
 0x134   : > { %v423_v31 = vmin.f32 %v421_v29, %v422_v30 }
 0x136   : > { %v424_v32 = vrot.slane %v423_v31, 1 }
 0x138   : > { %v425_v33 = vmin.f32 %v423_v31, %v424_v32 }
 0x13a   : > { %1598 = vpush %v425_v33 }
 0x16b   : > { %s1792_s19 = spop %1598 }
 0x16c   : > { %v427_v34 = vstv %s1792_s19 }
 0x16d   : > { %vm428_vm2 = vcmp.eq.f32.partialorder %v1788_v25, %v427_v34 }
 0x16e   : > { %v429_v35 = vsel %vm428_vm2, %v1780_v19, 16 }
 0x16f   : > { %v430_v36 = vsel %vm416_vm1, %v429_v35, 2147483647 }
 0x170   : > { %v432_v37 = vshra.s32 %v430_v36, 16  ;;  %v431_v40 = vand.u32 65535, %v430_v36 }
 0x172   : > { %v434_v38 = vcvt.s32.f32 %v432_v37  ;;  %v433_v42 = vcvt.s32.f32 %v431_v40 }
 0x174   : > { %435 = vmin.xlane.f32.xlu0 %v434_v38 }
 0x18a   : > { %358 = vperm.xlu0 %1673, %v349_v39  }
 0x201   : > { %v436_v41 = vpop.xlane.xlu0 %435 }
 0x202   : > { %vm437_vm3 = vcmp.eq.f32.partialorder %v434_v38, %v436_v41  ;;  %v442_v44 = vcvt.f32.s32 %v436_v41 }
 0x203   : > { %v438_v43 = vsel %vm437_vm3, %v433_v42, inf }
 0x204   : > { %439 = vmin.xlane.f32.xlu1 %v438_v43  ;;  %v443_v46 = vshll.u32 %v442_v44, 16 }
 0x209   : > { %v359_v56 = vpop.permute.xlu0 %358 }
 0x20a   : > { %v366_v58 = vsub.f32 %v359_v56, %v1774_v10 }
 0x20c   : > { %v368_v61 = vmul.f32 %v366_v58, %v366_v58 }
 0x215   : > { %376 = vperm.xlu1 %1674, %v349_v39  }
 0x219   : > { %1675 = vset.pattern.permute.xlu1 %v1690_v1  ;;  %v1806_v1 = vadd.s32 8, %v1766_v5 }
 0x21a   : > { %394 = vperm.xlu1 %1675, %v349_v39  }
 0x21e   : > { %1676 = vset.pattern.permute.xlu1 %v1689_v0 }
 0x291   : > { %v440_v45 = vpop.xlane.xlu1 %439 }
 0x292   : > { %v441_v47 = vcvt.f32.s32 %v440_v45 }
 0x294   : > { %v444_v48 = vadd.s32 %v443_v46, %v441_v47 }
 0x295   : > { %v377_v55 = vpop.permute.xlu1 %376 }
 0x296   : > { %v445_v49 = vrot.slane %v444_v48, 4  ;;  %v384_v57 = vsub.f32 %v377_v55, %v382_v14  ;;  %v1692_v14 = vmov 0.0  }
 0x297   : > { %v1554_v15 = vsel %vm412_vm0, 1.0, %v1692_v14 }
 0x298   : > { %vm446_vm4 = vcmp.lt.s32.totalorder %v444_v48, %v445_v49  ;;  %v386_v60 = vmul.f32 %v384_v57, %v384_v57 }
 0x299   : > { %v447_v50 = vsel %vm446_vm4, %v444_v48, %v445_v49  ;;  %v395_v59 = vpop.permute.xlu1 %394 }
 0x29a   : > { %v448_v51 = vrot.slane %v447_v50, 2  ;;  %v402_v62 = vsub.f32 %v395_v59, %v1776_v12  ;;  %v388_v63 = vadd.f32 %v386_v60, %v368_v61 }
 0x29c   : > { %vm449_vm5 = vcmp.lt.s32.totalorder %v447_v50, %v448_v51  ;;  %v404_v0 = vmul.f32 %v402_v62, %v402_v62 }
 0x29d   : > { %v450_v52 = vsel %vm449_vm5, %v447_v50, %v448_v51 }
 0x29e   : > { %v451_v53 = vrot.slane %v450_v52, 1  ;;  %v1808_v2 = vadd.f32 %v404_v0, %v388_v63 }
 0x2a0   : > { %vm452_vm6 = vcmp.lt.s32.totalorder %v450_v52, %v451_v53 }
 0x2a1   : > { %v453_v54 = vsel %vm452_vm6, %v450_v52, %v451_v53 }
 0x2a2   : > { %1600 = vpush %v453_v54 }
 0x2d3   : > { %s1601_s20 = spop %1600 }
 0x2d4   : > { %v456_v3 = vstv %s1601_s20 }
 0x2d5   : > { %vm459_vm8 = vcmp.eq.s32.totalorder %v1766_v5, %v456_v3  ;;  %vm460_vm9 = vcmp.eq.s32.totalorder %v1806_v1, %v456_v3  ;;  %vm457_vm10 = vcmp.eq.s32.totalorder %v1780_v19, %v456_v3 }
 0x2d6   : > { %v461_v4 = vsel %vm459_vm8, %v1783_v24, 0.0  ;;  %v462_v6 = vsel %vm460_vm9, %v1808_v2, 0.0  ;;  %v458_v17 = vsel %vm457_vm10, 1.0, %v1554_v15  ;;  %vm573_vm8 = vcmp.eq.s32.totalorder %v1780_v19, 2 }
 0x2d7   : > { %v464_v7 = vsel %vm463_vm7, %v461_v4, 0.0  ;;  %v465_v8 = vsel %vm463_vm7, %v462_v6, 0.0  ;;  %vm473_vm11 = vcmp.gt.f32.partialorder %v458_v17, 0.5 }
 0x2d8   : > { %v466_v9 = vadd.f32 %v465_v8, %v464_v7 }
 0x2da   : > { %v467_v10 = vrot.slane %v466_v9, 4 }
 0x2dc   : > { %v468_v11 = vadd.f32 %v467_v10, %v466_v9 }
 0x2de   : > { %v469_v12 = vrot.slane %v468_v11, 2 }
 0x2e0   : > { %v470_v13 = vadd.f32 %v469_v12, %v468_v11 }
 0x2e2   : > { %v471_v16 = vrot.slane %v470_v13, 1 }
 0x2e4   : > { %v472_v18 = vadd.f32 %v471_v16, %v470_v13 }
 0x2e6   : > { %v474_v20 = vmin.f32 %v1788_v25, %v472_v18  ;;  %v455_v25 = vsel %vm412_vm0, %v427_v34, 0.0 }
 0x2e8   : > { %v1821_v21 = vsel %vm473_vm11, 1e+30, %v474_v20 }
 0x2e9   : > { %v476_v22 = vsel %vm416_vm1, %v1821_v21, inf }
 0x2ea   : > { %477 = vmin.xlane.f32.xlu1 %v476_v22 }
 0x377   : > { %v478_v23 = vpop.xlane.xlu1 %477 }
 0x378   : > { %v479_v26 = vrot.slane %v478_v23, 4 }
 0x37a   : > { %v480_v27 = vmin.f32 %v478_v23, %v479_v26 }
 0x37c   : > { %v481_v28 = vrot.slane %v480_v27, 2 }
 0x37e   : > { %v482_v29 = vmin.f32 %v480_v27, %v481_v28 }
 0x380   : > { %v483_v30 = vrot.slane %v482_v29, 1 }
 0x382   : > { %v484_v31 = vmin.f32 %v482_v29, %v483_v30 }
 0x384   : > { %1602 = vpush %v484_v31 }
 0x3b5   : > { %s1603_s21 = spop %1602 }
 0x3b6   : > { %v486_v32 = vstv %s1603_s21 }
 0x3b7   : > { %vm487_vm13 = vcmp.eq.f32.partialorder %v1821_v21, %v486_v32  ;;  %v515_v33 = vsel %vm514_vm12, %v486_v32, %v455_v25 }
 0x3b8   : > { %v488_v35 = vsel %vm487_vm13, %v1780_v19, 16 }
 0x3b9   : > { %v489_v36 = vsel %vm416_vm1, %v488_v35, 2147483647 }
 0x3ba   : > { %v491_v37 = vshra.s32 %v489_v36, 16  ;;  %v490_v39 = vand.u32 65535, %v489_v36 }
 0x3bc   : > { %v493_v38 = vcvt.s32.f32 %v491_v37  ;;  %v492_v41 = vcvt.s32.f32 %v490_v39 }
 0x3be   : > { %494 = vmin.xlane.f32.xlu0 %v493_v38 }
 0x44b   : > { %v495_v40 = vpop.xlane.xlu0 %494 }
 0x44c   : > { %vm496_vm14 = vcmp.eq.f32.partialorder %v493_v38, %v495_v40  ;;  %v501_v43 = vcvt.f32.s32 %v495_v40 }
 0x44d   : > { %v497_v42 = vsel %vm496_vm14, %v492_v41, inf }
 0x44e   : > { %498 = vmin.xlane.f32.xlu1 %v497_v42  ;;  %v502_v34 = vshll.u32 %v501_v43, 16 }
 0x4db   : > { %v499_v44 = vpop.xlane.xlu1 %498 }
 0x4dc   : > { %v500_v45 = vcvt.f32.s32 %v499_v44 }
 0x4de   : > { %v503_v46 = vadd.s32 %v502_v34, %v500_v45 }
 0x4e0   : > { %v504_v47 = vrot.slane %v503_v46, 4 }
 0x4e2   : > { %vm505_vm15 = vcmp.lt.s32.totalorder %v503_v46, %v504_v47 }
 0x4e3   : > { %v506_v48 = vsel %vm505_vm15, %v503_v46, %v504_v47 }
 0x4e4   : > { %v507_v49 = vrot.slane %v506_v48, 2 }
 0x4e6   : > { %vm508_vm0 = vcmp.lt.s32.totalorder %v506_v48, %v507_v49 }
 0x4e7   : > { %v509_v50 = vsel %vm508_vm0, %v506_v48, %v507_v49 }
 0x4e8   : > { %v510_v51 = vrot.slane %v509_v50, 1 }
 0x4ea   : > { %vm511_vm2 = vcmp.lt.s32.totalorder %v509_v50, %v510_v51 }
 0x4eb   : > { %v512_v52 = vsel %vm511_vm2, %v509_v50, %v510_v51 }
 0x4ec   : > { %1604 = vpush %v512_v52 }
 0x51d   : > { %s1605_s22 = spop %1604 }
 0x51e   : > { %v516_v53 = vstv %s1605_s22 }
 0x51f   : > { %vm519_vm3 = vcmp.eq.s32.totalorder %v1766_v5, %v516_v53  ;;  %vm520_vm4 = vcmp.eq.s32.totalorder %v1806_v1, %v516_v53  ;;  %vm517_vm5 = vcmp.eq.s32.totalorder %v1780_v19, %v516_v53 }
 0x520   : > { %v521_v54 = vsel %vm519_vm3, %v1783_v24, 0.0  ;;  %v522_v55 = vsel %vm520_vm4, %v1808_v2, 0.0  ;;  %v518_v0 = vsel %vm517_vm5, 1.0, %v458_v17  ;;  %vm632_vm3 = vcmp.eq.s32.totalorder %v1780_v19, 3 }
 0x521   : > { %v523_v56 = vsel %vm463_vm7, %v521_v54, 0.0  ;;  %v524_v57 = vsel %vm463_vm7, %v522_v55, 0.0  ;;  %vm532_vm6 = vcmp.gt.f32.partialorder %v518_v0, 0.5 }
 0x522   : > { %v525_v58 = vadd.f32 %v524_v57, %v523_v56 }
 0x524   : > { %v526_v59 = vrot.slane %v525_v58, 4 }
 0x526   : > { %v527_v60 = vadd.f32 %v526_v59, %v525_v58 }
 0x528   : > { %v528_v61 = vrot.slane %v527_v60, 2 }
 0x52a   : > { %v529_v62 = vadd.f32 %v528_v61, %v527_v60 }
 0x52c   : > { %v530_v63 = vrot.slane %v529_v62, 1 }
 0x52e   : > { %v531_v3 = vadd.f32 %v530_v63, %v529_v62 }
 0x530   : > { %v533_v4 = vmin.f32 %v1821_v21, %v531_v3 }
 0x532   : > { %v534_v6 = vsel %vm532_vm6, 1e+30, %v533_v4 }
 0x533   : > { %v535_v7 = vsel %vm416_vm1, %v534_v6, inf }
 0x534   : > { %536 = vmin.xlane.f32.xlu1 %v535_v7 }
 0x5c1   : > { %v537_v8 = vpop.xlane.xlu1 %536 }
 0x5c2   : > { %v538_v9 = vrot.slane %v537_v8, 4 }
 0x5c4   : > { %v539_v10 = vmin.f32 %v537_v8, %v538_v9 }
 0x5c6   : > { %v540_v11 = vrot.slane %v539_v10, 2 }
 0x5c8   : > { %v541_v12 = vmin.f32 %v539_v10, %v540_v11 }
 0x5ca   : > { %v542_v13 = vrot.slane %v541_v12, 1 }
 0x5cc   : > { %v543_v15 = vmin.f32 %v541_v12, %v542_v13 }
 0x5ce   : > { %1606 = vpush %v543_v15 }
 0x5ff   : > { %s1607_s23 = spop %1606 }
 0x600   : > { %v545_v16 = vstv %s1607_s23 }
 0x601   : > { %vm546_vm9 = vcmp.eq.f32.partialorder %v534_v6, %v545_v16  ;;  %v574_v17 = vsel %vm573_vm8, %v545_v16, %v515_v33 }
 0x602   : > { %v547_v18 = vsel %vm546_vm9, %v1780_v19, 16 }
 0x603   : > { %v548_v20 = vsel %vm416_vm1, %v547_v18, 2147483647 }
 0x604   : > { %v550_v21 = vshra.s32 %v548_v20, 16  ;;  %v549_v23 = vand.u32 65535, %v548_v20 }
 0x606   : > { %v552_v22 = vcvt.s32.f32 %v550_v21  ;;  %v551_v27 = vcvt.s32.f32 %v549_v23 }
 0x608   : > { %553 = vmin.xlane.f32.xlu1 %v552_v22 }
 0x695   : > { %v554_v26 = vpop.xlane.xlu1 %553 }
 0x696   : > { %vm555_vm10 = vcmp.eq.f32.partialorder %v552_v22, %v554_v26  ;;  %v560_v29 = vcvt.f32.s32 %v554_v26 }
 0x697   : > { %v556_v28 = vsel %vm555_vm10, %v551_v27, inf }
 0x698   : > { %557 = vmin.xlane.f32.xlu1 %v556_v28  ;;  %v561_v31 = vshll.u32 %v560_v29, 16 }
 0x725   : > { %v558_v30 = vpop.xlane.xlu1 %557 }
 0x726   : > { %v559_v25 = vcvt.f32.s32 %v558_v30 }
 0x728   : > { %v562_v32 = vadd.s32 %v561_v31, %v559_v25 }
 0x72a   : > { %v563_v35 = vrot.slane %v562_v32, 4 }
 0x72c   : > { %vm564_vm11 = vcmp.lt.s32.totalorder %v562_v32, %v563_v35 }
 0x72d   : > { %v565_v33 = vsel %vm564_vm11, %v562_v32, %v563_v35 }
 0x72e   : > { %v566_v36 = vrot.slane %v565_v33, 2 }
 0x730   : > { %vm567_vm12 = vcmp.lt.s32.totalorder %v565_v33, %v566_v36 }
 0x731   : > { %v568_v37 = vsel %vm567_vm12, %v565_v33, %v566_v36 }
 0x732   : > { %v569_v38 = vrot.slane %v568_v37, 1 }
 0x734   : > { %vm570_vm13 = vcmp.lt.s32.totalorder %v568_v37, %v569_v38 }
 0x735   : > { %v571_v39 = vsel %vm570_vm13, %v568_v37, %v569_v38 }
 0x736   : > { %1608 = vpush %v571_v39 }
 0x767   : > { %s1609_s24 = spop %1608 }
 0x768   : > { %v575_v40 = vstv %s1609_s24 }
 0x769   : > { %vm578_vm14 = vcmp.eq.s32.totalorder %v1766_v5, %v575_v40  ;;  %vm579_vm15 = vcmp.eq.s32.totalorder %v1806_v1, %v575_v40  ;;  %vm576_vm0 = vcmp.eq.s32.totalorder %v1780_v19, %v575_v40 }
 0x76a   : > { %v580_v41 = vsel %vm578_vm14, %v1783_v24, 0.0  ;;  %v581_v42 = vsel %vm579_vm15, %v1808_v2, 0.0  ;;  %v577_v50 = vsel %vm576_vm0, 1.0, %v518_v0  ;;  %vm691_vm14 = vcmp.eq.s32.totalorder %v1780_v19, 4 }
 0x76b   : > { %v582_v43 = vsel %vm463_vm7, %v580_v41, 0.0  ;;  %v583_v44 = vsel %vm463_vm7, %v581_v42, 0.0  ;;  %vm591_vm2 = vcmp.gt.f32.partialorder %v577_v50, 0.5 }
 0x76c   : > { %v584_v34 = vadd.f32 %v583_v44, %v582_v43 }
 0x76e   : > { %v585_v45 = vrot.slane %v584_v34, 4 }
 0x770   : > { %v586_v46 = vadd.f32 %v585_v45, %v584_v34 }
 0x772   : > { %v587_v47 = vrot.slane %v586_v46, 2 }
 0x774   : > { %v588_v48 = vadd.f32 %v587_v47, %v586_v46 }
 0x776   : > { %v589_v49 = vrot.slane %v588_v48, 1 }
 0x778   : > { %v590_v51 = vadd.f32 %v589_v49, %v588_v48 }
 0x77a   : > { %v592_v52 = vmin.f32 %v534_v6, %v590_v51 }
 0x77c   : > { %v593_v53 = vsel %vm591_vm2, 1e+30, %v592_v52 }
 0x77d   : > { %v594_v54 = vsel %vm416_vm1, %v593_v53, inf }
 0x77e   : > { %595 = vmin.xlane.f32.xlu1 %v594_v54 }
 0x80b   : > { %v596_v55 = vpop.xlane.xlu1 %595 }
 0x80c   : > { %v597_v56 = vrot.slane %v596_v55, 4 }
 0x80e   : > { %v598_v57 = vmin.f32 %v596_v55, %v597_v56 }
 0x810   : > { %v599_v58 = vrot.slane %v598_v57, 2 }
 0x812   : > { %v600_v59 = vmin.f32 %v598_v57, %v599_v58 }
 0x814   : > { %v601_v60 = vrot.slane %v600_v59, 1 }
 0x816   : > { %v602_v61 = vmin.f32 %v600_v59, %v601_v60 }
 0x818   : > { %1610 = vpush %v602_v61 }
 0x849   : > { %s1611_s25 = spop %1610 }
 0x84a   : > { %v604_v62 = vstv %s1611_s25 }
 0x84b   : > { %vm605_vm4 = vcmp.eq.f32.partialorder %v593_v53, %v604_v62  ;;  %v633_v63 = vsel %vm632_vm3, %v604_v62, %v574_v17 }
 0x84c   : > { %v606_v0 = vsel %vm605_vm4, %v1780_v19, 16 }
 0x84d   : > { %v607_v3 = vsel %vm416_vm1, %v606_v0, 2147483647 }
 0x84e   : > { %v609_v4 = vshra.s32 %v607_v3, 16  ;;  %v608_v7 = vand.u32 65535, %v607_v3 }
 0x850   : > { %v611_v6 = vcvt.s32.f32 %v609_v4  ;;  %v610_v9 = vcvt.s32.f32 %v608_v7 }
 0x852   : > { %612 = vmin.xlane.f32.xlu0 %v611_v6 }
 0x8df   : > { %v613_v8 = vpop.xlane.xlu0 %612 }
 0x8e0   : > { %vm614_vm5 = vcmp.eq.f32.partialorder %v611_v6, %v613_v8  ;;  %v619_v11 = vcvt.f32.s32 %v613_v8 }
 0x8e1   : > { %v615_v10 = vsel %vm614_vm5, %v610_v9, inf }
 0x8e2   : > { %616 = vmin.xlane.f32.xlu1 %v615_v10  ;;  %v620_v13 = vshll.u32 %v619_v11, 16 }
 0x96f   : > { %v617_v12 = vpop.xlane.xlu1 %616 }
 0x970   : > { %v618_v15 = vcvt.f32.s32 %v617_v12 }
 0x972   : > { %v621_v16 = vadd.s32 %v620_v13, %v618_v15 }
 0x974   : > { %v622_v18 = vrot.slane %v621_v16, 4 }
 0x976   : > { %vm623_vm6 = vcmp.lt.s32.totalorder %v621_v16, %v622_v18 }
 0x977   : > { %v624_v17 = vsel %vm623_vm6, %v621_v16, %v622_v18 }
 0x978   : > { %v625_v20 = vrot.slane %v624_v17, 2 }
 0x97a   : > { %vm626_vm8 = vcmp.lt.s32.totalorder %v624_v17, %v625_v20 }
 0x97b   : > { %v627_v21 = vsel %vm626_vm8, %v624_v17, %v625_v20 }
 0x97c   : > { %v628_v22 = vrot.slane %v627_v21, 1 }
 0x97e   : > { %vm629_vm9 = vcmp.lt.s32.totalorder %v627_v21, %v628_v22 }
 0x97f   : > { %v630_v23 = vsel %vm629_vm9, %v627_v21, %v628_v22 }
 0x980   : > { %1612 = vpush %v630_v23 }
 0x9b1   : > { %s1613_s26 = spop %1612 }
 0x9b2   : > { %v634_v26 = vstv %s1613_s26 }
 0x9b3   : > { %vm637_vm10 = vcmp.eq.s32.totalorder %v1766_v5, %v634_v26  ;;  %vm638_vm11 = vcmp.eq.s32.totalorder %v1806_v1, %v634_v26  ;;  %vm635_vm12 = vcmp.eq.s32.totalorder %v1780_v19, %v634_v26 }
 0x9b4   : > { %v639_v27 = vsel %vm637_vm10, %v1783_v24, 0.0  ;;  %v640_v28 = vsel %vm638_vm11, %v1808_v2, 0.0  ;;  %v636_v37 = vsel %vm635_vm12, 1.0, %v577_v50  ;;  %vm750_vm10 = vcmp.eq.s32.totalorder %v1780_v19, 5 }
 0x9b5   : > { %v641_v29 = vsel %vm463_vm7, %v639_v27, 0.0  ;;  %v642_v30 = vsel %vm463_vm7, %v640_v28, 0.0  ;;  %vm650_vm13 = vcmp.gt.f32.partialorder %v636_v37, 0.5 }
 0x9b6   : > { %v643_v31 = vadd.f32 %v642_v30, %v641_v29 }
 0x9b8   : > { %v644_v25 = vrot.slane %v643_v31, 4 }
 0x9ba   : > { %v645_v32 = vadd.f32 %v644_v25, %v643_v31 }
 0x9bc   : > { %v646_v35 = vrot.slane %v645_v32, 2 }
 0x9be   : > { %v647_v33 = vadd.f32 %v646_v35, %v645_v32 }
 0x9c0   : > { %v648_v36 = vrot.slane %v647_v33, 1 }
 0x9c2   : > { %v649_v38 = vadd.f32 %v648_v36, %v647_v33 }
 0x9c4   : > { %v651_v39 = vmin.f32 %v593_v53, %v649_v38 }
 0x9c6   : > { %v652_v40 = vsel %vm650_vm13, 1e+30, %v651_v39 }
 0x9c7   : > { %v653_v41 = vsel %vm416_vm1, %v652_v40, inf }
 0x9c8   : > { %654 = vmin.xlane.f32.xlu0 %v653_v41 }
 0xa55   : > { %v655_v42 = vpop.xlane.xlu0 %654 }
 0xa56   : > { %v656_v43 = vrot.slane %v655_v42, 4 }
 0xa58   : > { %v657_v44 = vmin.f32 %v655_v42, %v656_v43 }
 0xa5a   : > { %v658_v34 = vrot.slane %v657_v44, 2 }
 0xa5c   : > { %v659_v45 = vmin.f32 %v657_v44, %v658_v34 }
 0xa5e   : > { %v660_v46 = vrot.slane %v659_v45, 1 }
 0xa60   : > { %v661_v47 = vmin.f32 %v659_v45, %v660_v46 }
 0xa62   : > { %1614 = vpush %v661_v47 }
 0xa93   : > { %s1615_s27 = spop %1614 }
 0xa94   : > { %v663_v48 = vstv %s1615_s27 }
 0xa95   : > { %vm664_vm15 = vcmp.eq.f32.partialorder %v652_v40, %v663_v48  ;;  %v692_v49 = vsel %vm691_vm14, %v663_v48, %v633_v63 }
 0xa96   : > { %v665_v50 = vsel %vm664_vm15, %v1780_v19, 16 }
 0xa97   : > { %v666_v51 = vsel %vm416_vm1, %v665_v50, 2147483647 }
 0xa98   : > { %v668_v52 = vshra.s32 %v666_v51, 16  ;;  %v667_v54 = vand.u32 65535, %v666_v51 }
 0xa9a   : > { %v670_v53 = vcvt.s32.f32 %v668_v52  ;;  %v669_v56 = vcvt.s32.f32 %v667_v54 }
 0xa9c   : > { %671 = vmin.xlane.f32.xlu1 %v670_v53 }
 0xb29   : > { %v672_v55 = vpop.xlane.xlu1 %671 }
 0xb2a   : > { %vm673_vm0 = vcmp.eq.f32.partialorder %v670_v53, %v672_v55  ;;  %v678_v58 = vcvt.f32.s32 %v672_v55 }
 0xb2b   : > { %v674_v57 = vsel %vm673_vm0, %v669_v56, inf }
 0xb2c   : > { %675 = vmin.xlane.f32.xlu0 %v674_v57  ;;  %v679_v60 = vshll.u32 %v678_v58, 16 }
 0xbb9   : > { %v676_v59 = vpop.xlane.xlu0 %675 }
 0xbba   : > { %v677_v61 = vcvt.f32.s32 %v676_v59 }
 0xbbc   : > { %v680_v62 = vadd.s32 %v679_v60, %v677_v61 }
 0xbbe   : > { %v681_v0 = vrot.slane %v680_v62, 4 }
 0xbc0   : > { %vm682_vm2 = vcmp.lt.s32.totalorder %v680_v62, %v681_v0 }
 0xbc1   : > { %v683_v63 = vsel %vm682_vm2, %v680_v62, %v681_v0 }
 0xbc2   : > { %v684_v3 = vrot.slane %v683_v63, 2 }
 0xbc4   : > { %vm685_vm3 = vcmp.lt.s32.totalorder %v683_v63, %v684_v3 }
 0xbc5   : > { %v686_v4 = vsel %vm685_vm3, %v683_v63, %v684_v3 }
 0xbc6   : > { %v687_v6 = vrot.slane %v686_v4, 1 }
 0xbc8   : > { %vm688_vm4 = vcmp.lt.s32.totalorder %v686_v4, %v687_v6 }
 0xbc9   : > { %v689_v7 = vsel %vm688_vm4, %v686_v4, %v687_v6 }
 0xbca   : > { %1616 = vpush %v689_v7 }
 0xbfb   : > { %s1617_s28 = spop %1616 }
 0xbfc   : > { %v693_v8 = vstv %s1617_s28 }
 0xbfd   : > { %vm696_vm5 = vcmp.eq.s32.totalorder %v1766_v5, %v693_v8  ;;  %vm697_vm6 = vcmp.eq.s32.totalorder %v1806_v1, %v693_v8  ;;  %vm694_vm8 = vcmp.eq.s32.totalorder %v1780_v19, %v693_v8 }
 0xbfe   : > { %v698_v9 = vsel %vm696_vm5, %v1783_v24, 0.0  ;;  %v699_v10 = vsel %vm697_vm6, %v1808_v2, 0.0  ;;  %v695_v21 = vsel %vm694_vm8, 1.0, %v636_v37  ;;  %vm809_vm5 = vcmp.eq.s32.totalorder %v1780_v19, 6 }
 0xbff   : > { %v700_v11 = vsel %vm463_vm7, %v698_v9, 0.0  ;;  %v701_v12 = vsel %vm463_vm7, %v699_v10, 0.0  ;;  %vm709_vm9 = vcmp.gt.f32.partialorder %v695_v21, 0.5 }
 0xc00   : > { %v702_v13 = vadd.f32 %v701_v12, %v700_v11 }
 0xc02   : > { %v703_v15 = vrot.slane %v702_v13, 4 }
 0xc04   : > { %v704_v16 = vadd.f32 %v703_v15, %v702_v13 }
 0xc06   : > { %v705_v18 = vrot.slane %v704_v16, 2 }
 0xc08   : > { %v706_v17 = vadd.f32 %v705_v18, %v704_v16 }
 0xc0a   : > { %v707_v20 = vrot.slane %v706_v17, 1 }
 0xc0c   : > { %v708_v22 = vadd.f32 %v707_v20, %v706_v17 }
 0xc0e   : > { %v710_v23 = vmin.f32 %v652_v40, %v708_v22 }
 0xc10   : > { %v711_v26 = vsel %vm709_vm9, 1e+30, %v710_v23 }
 0xc11   : > { %v712_v27 = vsel %vm416_vm1, %v711_v26, inf }
 0xc12   : > { %713 = vmin.xlane.f32.xlu1 %v712_v27 }
 0xc9f   : > { %v714_v28 = vpop.xlane.xlu1 %713 }
 0xca0   : > { %v715_v29 = vrot.slane %v714_v28, 4 }
 0xca2   : > { %v716_v30 = vmin.f32 %v714_v28, %v715_v29 }
 0xca4   : > { %v717_v31 = vrot.slane %v716_v30, 2 }
 0xca6   : > { %v718_v25 = vmin.f32 %v716_v30, %v717_v31 }
 0xca8   : > { %v719_v32 = vrot.slane %v718_v25, 1 }
 0xcaa   : > { %v720_v35 = vmin.f32 %v718_v25, %v719_v32 }
 0xcac   : > { %1618 = vpush %v720_v35 }
 0xcdd   : > { %s1619_s29 = spop %1618 }
 0xcde   : > { %v722_v33 = vstv %s1619_s29 }
 0xcdf   : > { %vm723_vm11 = vcmp.eq.f32.partialorder %v711_v26, %v722_v33  ;;  %v751_v36 = vsel %vm750_vm10, %v722_v33, %v692_v49 }
 0xce0   : > { %v724_v37 = vsel %vm723_vm11, %v1780_v19, 16 }
 0xce1   : > { %v725_v38 = vsel %vm416_vm1, %v724_v37, 2147483647 }
 0xce2   : > { %v727_v39 = vshra.s32 %v725_v38, 16  ;;  %v726_v41 = vand.u32 65535, %v725_v38 }
 0xce4   : > { %v729_v40 = vcvt.s32.f32 %v727_v39  ;;  %v728_v43 = vcvt.s32.f32 %v726_v41 }
 0xce6   : > { %730 = vmin.xlane.f32.xlu0 %v729_v40 }
 0xd73   : > { %v731_v42 = vpop.xlane.xlu0 %730 }
 0xd74   : > { %vm732_vm12 = vcmp.eq.f32.partialorder %v729_v40, %v731_v42  ;;  %v737_v34 = vcvt.f32.s32 %v731_v42 }
 0xd75   : > { %v733_v44 = vsel %vm732_vm12, %v728_v43, inf }
 0xd76   : > { %734 = vmin.xlane.f32.xlu1 %v733_v44  ;;  %v738_v46 = vshll.u32 %v737_v34, 16 }
 0xe03   : > { %v735_v45 = vpop.xlane.xlu1 %734 }
 0xe04   : > { %v736_v47 = vcvt.f32.s32 %v735_v45 }
 0xe06   : > { %v739_v48 = vadd.s32 %v738_v46, %v736_v47 }
 0xe08   : > { %v740_v50 = vrot.slane %v739_v48, 4 }
 0xe0a   : > { %vm741_vm13 = vcmp.lt.s32.totalorder %v739_v48, %v740_v50 }
 0xe0b   : > { %v742_v49 = vsel %vm741_vm13, %v739_v48, %v740_v50 }
 0xe0c   : > { %v743_v51 = vrot.slane %v742_v49, 2 }
 0xe0e   : > { %vm744_vm14 = vcmp.lt.s32.totalorder %v742_v49, %v743_v51 }
 0xe0f   : > { %v745_v52 = vsel %vm744_vm14, %v742_v49, %v743_v51 }
 0xe10   : > { %v746_v53 = vrot.slane %v745_v52, 1 }
 0xe12   : > { %vm747_vm15 = vcmp.lt.s32.totalorder %v745_v52, %v746_v53 }
 0xe13   : > { %v748_v54 = vsel %vm747_vm15, %v745_v52, %v746_v53 }
 0xe14   : > { %1620 = vpush %v748_v54 }
 0xe45   : > { %s1621_s11 = spop %1620 }
 0xe46   : > { %v752_v55 = vstv %s1621_s11 }
 0xe47   : > { %vm755_vm0 = vcmp.eq.s32.totalorder %v1766_v5, %v752_v55  ;;  %vm756_vm2 = vcmp.eq.s32.totalorder %v1806_v1, %v752_v55  ;;  %vm753_vm3 = vcmp.eq.s32.totalorder %v1780_v19, %v752_v55 }
 0xe48   : > { %v757_v56 = vsel %vm755_vm0, %v1783_v24, 0.0  ;;  %v758_v57 = vsel %vm756_vm2, %v1808_v2, 0.0  ;;  %v754_v4 = vsel %vm753_vm3, 1.0, %v695_v21  ;;  %vm868_vm0 = vcmp.eq.s32.totalorder %v1780_v19, 7 }
 0xe49   : > { %v759_v58 = vsel %vm463_vm7, %v757_v56, 0.0  ;;  %v760_v59 = vsel %vm463_vm7, %v758_v57, 0.0  ;;  %vm768_vm4 = vcmp.gt.f32.partialorder %v754_v4, 0.5 }
 0xe4a   : > { %v761_v60 = vadd.f32 %v760_v59, %v759_v58 }
 0xe4c   : > { %v762_v61 = vrot.slane %v761_v60, 4 }
 0xe4e   : > { %v763_v62 = vadd.f32 %v762_v61, %v761_v60 }
 0xe50   : > { %v764_v0 = vrot.slane %v763_v62, 2 }
 0xe52   : > { %v765_v63 = vadd.f32 %v764_v0, %v763_v62 }
 0xe54   : > { %v766_v3 = vrot.slane %v765_v63, 1 }
 0xe56   : > { %v767_v6 = vadd.f32 %v766_v3, %v765_v63 }
 0xe58   : > { %v769_v7 = vmin.f32 %v711_v26, %v767_v6 }
 0xe5a   : > { %v770_v8 = vsel %vm768_vm4, 1e+30, %v769_v7 }
 0xe5b   : > { %v771_v9 = vsel %vm416_vm1, %v770_v8, inf }
 0xe5c   : > { %772 = vmin.xlane.f32.xlu0 %v771_v9 }
 0xee9   : > { %v773_v10 = vpop.xlane.xlu0 %772 }
 0xeea   : > { %v774_v11 = vrot.slane %v773_v10, 4 }
 0xeec   : > { %v775_v12 = vmin.f32 %v773_v10, %v774_v11 }
 0xeee   : > { %v776_v13 = vrot.slane %v775_v12, 2 }
 0xef0   : > { %v777_v15 = vmin.f32 %v775_v12, %v776_v13 }
 0xef2   : > { %v778_v16 = vrot.slane %v777_v15, 1 }
 0xef4   : > { %v779_v18 = vmin.f32 %v777_v15, %v778_v16 }
 0xef6   : > { %1622 = vpush %v779_v18 }
 0xf27   : > { %s1623_s12 = spop %1622 }
 0xf28   : > { %v781_v17 = vstv %s1623_s12 }
 0xf29   : > { %vm782_vm6 = vcmp.eq.f32.partialorder %v770_v8, %v781_v17  ;;  %v810_v20 = vsel %vm809_vm5, %v781_v17, %v751_v36 }
 0xf2a   : > { %v783_v21 = vsel %vm782_vm6, %v1780_v19, 16 }
 0xf2b   : > { %v784_v22 = vsel %vm416_vm1, %v783_v21, 2147483647 }
 0xf2c   : > { %v786_v23 = vshra.s32 %v784_v22, 16  ;;  %v785_v27 = vand.u32 65535, %v784_v22 }
 0xf2e   : > { %v788_v26 = vcvt.s32.f32 %v786_v23  ;;  %v787_v29 = vcvt.s32.f32 %v785_v27 }
 0xf30   : > { %789 = vmin.xlane.f32.xlu1 %v788_v26 }
 0xfbd   : > { %v790_v28 = vpop.xlane.xlu1 %789 }
 0xfbe   : > { %vm791_vm8 = vcmp.eq.f32.partialorder %v788_v26, %v790_v28  ;;  %v796_v31 = vcvt.f32.s32 %v790_v28 }
 0xfbf   : > { %v792_v30 = vsel %vm791_vm8, %v787_v29, inf }
 0xfc0   : > { %793 = vmin.xlane.f32.xlu0 %v792_v30  ;;  %v797_v32 = vshll.u32 %v796_v31, 16 }
0x104d   : > { %v794_v25 = vpop.xlane.xlu0 %793 }
0x104e   : > { %v795_v35 = vcvt.f32.s32 %v794_v25 }
0x1050   : > { %v798_v33 = vadd.s32 %v797_v32, %v795_v35 }
0x1052   : > { %v799_v37 = vrot.slane %v798_v33, 4 }
0x1054   : > { %vm800_vm9 = vcmp.lt.s32.totalorder %v798_v33, %v799_v37 }
0x1055   : > { %v801_v36 = vsel %vm800_vm9, %v798_v33, %v799_v37 }
0x1056   : > { %v802_v38 = vrot.slane %v801_v36, 2 }
0x1058   : > { %vm803_vm10 = vcmp.lt.s32.totalorder %v801_v36, %v802_v38 }
0x1059   : > { %v804_v39 = vsel %vm803_vm10, %v801_v36, %v802_v38 }
0x105a   : > { %v805_v40 = vrot.slane %v804_v39, 1 }
0x105c   : > { %vm806_vm11 = vcmp.lt.s32.totalorder %v804_v39, %v805_v40 }
0x105d   : > { %v807_v41 = vsel %vm806_vm11, %v804_v39, %v805_v40 }
0x105e   : > { %1624 = vpush %v807_v41 }
0x108f   : > { %s1625_s13 = spop %1624 }
0x1090   : > { %v811_v42 = vstv %s1625_s13 }
0x1091   : > { %vm814_vm12 = vcmp.eq.s32.totalorder %v1766_v5, %v811_v42  ;;  %vm815_vm13 = vcmp.eq.s32.totalorder %v1806_v1, %v811_v42  ;;  %vm812_vm14 = vcmp.eq.s32.totalorder %v1780_v19, %v811_v42 }
0x1092   : > { %v816_v43 = vsel %vm814_vm12, %v1783_v24, 0.0  ;;  %v817_v44 = vsel %vm815_vm13, %v1808_v2, 0.0  ;;  %v813_v52 = vsel %vm812_vm14, 1.0, %v754_v4  ;;  %vm927_vm12 = vcmp.eq.s32.totalorder %v1780_v19, 8 }
0x1093   : > { %v818_v34 = vsel %vm463_vm7, %v816_v43, 0.0  ;;  %v819_v45 = vsel %vm463_vm7, %v817_v44, 0.0  ;;  %vm827_vm15 = vcmp.gt.f32.partialorder %v813_v52, 0.5 }
0x1094   : > { %v820_v46 = vadd.f32 %v819_v45, %v818_v34 }
0x1096   : > { %v821_v47 = vrot.slane %v820_v46, 4 }
0x1098   : > { %v822_v48 = vadd.f32 %v821_v47, %v820_v46 }
0x109a   : > { %v823_v50 = vrot.slane %v822_v48, 2 }
0x109c   : > { %v824_v49 = vadd.f32 %v823_v50, %v822_v48 }
0x109e   : > { %v825_v51 = vrot.slane %v824_v49, 1 }
0x10a0   : > { %v826_v53 = vadd.f32 %v825_v51, %v824_v49 }
0x10a2   : > { %v828_v54 = vmin.f32 %v770_v8, %v826_v53 }
0x10a4   : > { %v829_v55 = vsel %vm827_vm15, 1e+30, %v828_v54 }
0x10a5   : > { %v830_v56 = vsel %vm416_vm1, %v829_v55, inf }
0x10a6   : > { %831 = vmin.xlane.f32.xlu1 %v830_v56 }
0x1133   : > { %v832_v57 = vpop.xlane.xlu1 %831 }
0x1134   : > { %v833_v58 = vrot.slane %v832_v57, 4 }
0x1136   : > { %v834_v59 = vmin.f32 %v832_v57, %v833_v58 }
0x1138   : > { %v835_v60 = vrot.slane %v834_v59, 2 }
0x113a   : > { %v836_v61 = vmin.f32 %v834_v59, %v835_v60 }
0x113c   : > { %v837_v62 = vrot.slane %v836_v61, 1 }
0x113e   : > { %v838_v0 = vmin.f32 %v836_v61, %v837_v62 }
0x1140   : > { %1626 = vpush %v838_v0 }
0x1171   : > { %s1627_s14 = spop %1626 }
0x1172   : > { %v840_v63 = vstv %s1627_s14 }
0x1173   : > { %vm841_vm2 = vcmp.eq.f32.partialorder %v829_v55, %v840_v63  ;;  %v869_v3 = vsel %vm868_vm0, %v840_v63, %v810_v20 }
0x1174   : > { %v842_v4 = vsel %vm841_vm2, %v1780_v19, 16 }
0x1175   : > { %v843_v6 = vsel %vm416_vm1, %v842_v4, 2147483647 }
0x1176   : > { %v845_v7 = vshra.s32 %v843_v6, 16  ;;  %v844_v9 = vand.u32 65535, %v843_v6 }
0x1178   : > { %v847_v8 = vcvt.s32.f32 %v845_v7  ;;  %v846_v11 = vcvt.s32.f32 %v844_v9 }
0x117a   : > { %848 = vmin.xlane.f32.xlu0 %v847_v8 }
0x1207   : > { %v849_v10 = vpop.xlane.xlu0 %848 }
0x1208   : > { %vm850_vm3 = vcmp.eq.f32.partialorder %v847_v8, %v849_v10  ;;  %v855_v13 = vcvt.f32.s32 %v849_v10 }
0x1209   : > { %v851_v12 = vsel %vm850_vm3, %v846_v11, inf }
0x120a   : > { %852 = vmin.xlane.f32.xlu1 %v851_v12  ;;  %v856_v16 = vshll.u32 %v855_v13, 16 }
0x1297   : > { %v853_v15 = vpop.xlane.xlu1 %852 }
0x1298   : > { %v854_v18 = vcvt.f32.s32 %v853_v15 }
0x129a   : > { %v857_v17 = vadd.s32 %v856_v16, %v854_v18 }
0x129c   : > { %v858_v21 = vrot.slane %v857_v17, 4 }
0x129e   : > { %vm859_vm4 = vcmp.lt.s32.totalorder %v857_v17, %v858_v21 }
0x129f   : > { %v860_v20 = vsel %vm859_vm4, %v857_v17, %v858_v21 }
0x12a0   : > { %v861_v22 = vrot.slane %v860_v20, 2 }
0x12a2   : > { %vm862_vm5 = vcmp.lt.s32.totalorder %v860_v20, %v861_v22 }
0x12a3   : > { %v863_v23 = vsel %vm862_vm5, %v860_v20, %v861_v22 }
0x12a4   : > { %v864_v26 = vrot.slane %v863_v23, 1 }
0x12a6   : > { %vm865_vm6 = vcmp.lt.s32.totalorder %v863_v23, %v864_v26 }
0x12a7   : > { %v866_v27 = vsel %vm865_vm6, %v863_v23, %v864_v26 }
0x12a8   : > { %1628 = vpush %v866_v27 }
0x12d9   : > { %s1629_s15 = spop %1628 }
0x12da   : > { %v870_v28 = vstv %s1629_s15 }
0x12db   : > { %vm873_vm8 = vcmp.eq.s32.totalorder %v1766_v5, %v870_v28  ;;  %vm874_vm9 = vcmp.eq.s32.totalorder %v1806_v1, %v870_v28  ;;  %vm871_vm10 = vcmp.eq.s32.totalorder %v1780_v19, %v870_v28 }
0x12dc   : > { %v875_v29 = vsel %vm873_vm8, %v1783_v24, 0.0  ;;  %v876_v30 = vsel %vm874_vm9, %v1808_v2, 0.0  ;;  %v872_v39 = vsel %vm871_vm10, 1.0, %v813_v52  ;;  %vm986_vm8 = vcmp.eq.s32.totalorder %v1780_v19, 9 }
0x12dd   : > { %v877_v31 = vsel %vm463_vm7, %v875_v29, 0.0  ;;  %v878_v25 = vsel %vm463_vm7, %v876_v30, 0.0  ;;  %vm886_vm11 = vcmp.gt.f32.partialorder %v872_v39, 0.5 }
0x12de   : > { %v879_v32 = vadd.f32 %v878_v25, %v877_v31 }
0x12e0   : > { %v880_v35 = vrot.slane %v879_v32, 4 }
0x12e2   : > { %v881_v33 = vadd.f32 %v880_v35, %v879_v32 }
0x12e4   : > { %v882_v37 = vrot.slane %v881_v33, 2 }
0x12e6   : > { %v883_v36 = vadd.f32 %v882_v37, %v881_v33 }
0x12e8   : > { %v884_v38 = vrot.slane %v883_v36, 1 }
0x12ea   : > { %v885_v40 = vadd.f32 %v884_v38, %v883_v36 }
0x12ec   : > { %v887_v41 = vmin.f32 %v829_v55, %v885_v40 }
0x12ee   : > { %v888_v42 = vsel %vm886_vm11, 1e+30, %v887_v41 }
0x12ef   : > { %v889_v43 = vsel %vm416_vm1, %v888_v42, inf }
0x12f0   : > { %890 = vmin.xlane.f32.xlu0 %v889_v43 }
0x137d   : > { %v891_v44 = vpop.xlane.xlu0 %890 }
0x137e   : > { %v892_v34 = vrot.slane %v891_v44, 4 }
0x1380   : > { %v893_v45 = vmin.f32 %v891_v44, %v892_v34 }
0x1382   : > { %v894_v46 = vrot.slane %v893_v45, 2 }
0x1384   : > { %v895_v47 = vmin.f32 %v893_v45, %v894_v46 }
0x1386   : > { %v896_v48 = vrot.slane %v895_v47, 1 }
0x1388   : > { %v897_v50 = vmin.f32 %v895_v47, %v896_v48 }
0x138a   : > { %1630 = vpush %v897_v50 }
0x13bb   : > { %s1631_s16 = spop %1630 }
0x13bc   : > { %v899_v49 = vstv %s1631_s16 }
0x13bd   : > { %vm900_vm13 = vcmp.eq.f32.partialorder %v888_v42, %v899_v49  ;;  %v928_v51 = vsel %vm927_vm12, %v899_v49, %v869_v3 }
0x13be   : > { %v901_v52 = vsel %vm900_vm13, %v1780_v19, 16 }
0x13bf   : > { %v902_v53 = vsel %vm416_vm1, %v901_v52, 2147483647 }
0x13c0   : > { %v904_v54 = vshra.s32 %v902_v53, 16  ;;  %v903_v56 = vand.u32 65535, %v902_v53 }
0x13c2   : > { %v906_v55 = vcvt.s32.f32 %v904_v54  ;;  %v905_v58 = vcvt.s32.f32 %v903_v56 }
0x13c4   : > { %907 = vmin.xlane.f32.xlu1 %v906_v55 }
0x1451   : > { %v908_v57 = vpop.xlane.xlu1 %907 }
0x1452   : > { %vm909_vm14 = vcmp.eq.f32.partialorder %v906_v55, %v908_v57  ;;  %v914_v60 = vcvt.f32.s32 %v908_v57 }
0x1453   : > { %v910_v59 = vsel %vm909_vm14, %v905_v58, inf }
0x1454   : > { %911 = vmin.xlane.f32.xlu0 %v910_v59  ;;  %v915_v62 = vshll.u32 %v914_v60, 16 }
0x14e1   : > { %v912_v61 = vpop.xlane.xlu0 %911 }
0x14e2   : > { %v913_v0 = vcvt.f32.s32 %v912_v61 }
0x14e4   : > { %v916_v63 = vadd.s32 %v915_v62, %v913_v0 }
0x14e6   : > { %v917_v4 = vrot.slane %v916_v63, 4 }
0x14e8   : > { %vm918_vm15 = vcmp.lt.s32.totalorder %v916_v63, %v917_v4 }
0x14e9   : > { %v919_v3 = vsel %vm918_vm15, %v916_v63, %v917_v4 }
0x14ea   : > { %v920_v6 = vrot.slane %v919_v3, 2 }
0x14ec   : > { %vm921_vm0 = vcmp.lt.s32.totalorder %v919_v3, %v920_v6 }
0x14ed   : > { %v922_v7 = vsel %vm921_vm0, %v919_v3, %v920_v6 }
0x14ee   : > { %v923_v8 = vrot.slane %v922_v7, 1 }
0x14f0   : > { %vm924_vm2 = vcmp.lt.s32.totalorder %v922_v7, %v923_v8 }
0x14f1   : > { %v925_v9 = vsel %vm924_vm2, %v922_v7, %v923_v8 }
0x14f2   : > { %1632 = vpush %v925_v9 }
0x1523   : > { %s1633_s17 = spop %1632 }
0x1524   : > { %v929_v10 = vstv %s1633_s17 }
0x1525   : > { %vm932_vm3 = vcmp.eq.s32.totalorder %v1766_v5, %v929_v10  ;;  %vm933_vm4 = vcmp.eq.s32.totalorder %v1806_v1, %v929_v10  ;;  %vm930_vm5 = vcmp.eq.s32.totalorder %v1780_v19, %v929_v10 }
0x1526   : > { %v934_v11 = vsel %vm932_vm3, %v1783_v24, 0.0  ;;  %v935_v12 = vsel %vm933_vm4, %v1808_v2, 0.0  ;;  %v931_v23 = vsel %vm930_vm5, 1.0, %v872_v39  ;;  %vm1045_vm3 = vcmp.eq.s32.totalorder %v1780_v19, 10 }
0x1527   : > { %v936_v13 = vsel %vm463_vm7, %v934_v11, 0.0  ;;  %v937_v15 = vsel %vm463_vm7, %v935_v12, 0.0  ;;  %vm945_vm6 = vcmp.gt.f32.partialorder %v931_v23, 0.5 }
0x1528   : > { %v938_v16 = vadd.f32 %v937_v15, %v936_v13 }
0x152a   : > { %v939_v18 = vrot.slane %v938_v16, 4 }
0x152c   : > { %v940_v17 = vadd.f32 %v939_v18, %v938_v16 }
0x152e   : > { %v941_v21 = vrot.slane %v940_v17, 2 }
0x1530   : > { %v942_v20 = vadd.f32 %v941_v21, %v940_v17 }
0x1532   : > { %v943_v22 = vrot.slane %v942_v20, 1 }
0x1534   : > { %v944_v26 = vadd.f32 %v943_v22, %v942_v20 }
0x1536   : > { %v946_v27 = vmin.f32 %v888_v42, %v944_v26 }
0x1538   : > { %v947_v28 = vsel %vm945_vm6, 1e+30, %v946_v27 }
0x1539   : > { %v948_v29 = vsel %vm416_vm1, %v947_v28, inf }
0x153a   : > { %949 = vmin.xlane.f32.xlu1 %v948_v29 }
0x15c7   : > { %v950_v30 = vpop.xlane.xlu1 %949 }
0x15c8   : > { %v951_v31 = vrot.slane %v950_v30, 4 }
0x15ca   : > { %v952_v25 = vmin.f32 %v950_v30, %v951_v31 }
0x15cc   : > { %v953_v32 = vrot.slane %v952_v25, 2 }
0x15ce   : > { %v954_v35 = vmin.f32 %v952_v25, %v953_v32 }
0x15d0   : > { %v955_v33 = vrot.slane %v954_v35, 1 }
0x15d2   : > { %v956_v37 = vmin.f32 %v954_v35, %v955_v33 }
0x15d4   : > { %1634 = vpush %v956_v37 }
0x1605   : > { %s1635_s18 = spop %1634 }
0x1606   : > { %v958_v36 = vstv %s1635_s18 }
0x1607   : > { %vm959_vm9 = vcmp.eq.f32.partialorder %v947_v28, %v958_v36  ;;  %v987_v38 = vsel %vm986_vm8, %v958_v36, %v928_v51 }
0x1608   : > { %v960_v39 = vsel %vm959_vm9, %v1780_v19, 16 }
0x1609   : > { %v961_v40 = vsel %vm416_vm1, %v960_v39, 2147483647 }
0x160a   : > { %v963_v41 = vshra.s32 %v961_v40, 16  ;;  %v962_v43 = vand.u32 65535, %v961_v40 }
0x160c   : > { %v965_v42 = vcvt.s32.f32 %v963_v41  ;;  %v964_v34 = vcvt.s32.f32 %v962_v43 }
0x160e   : > { %966 = vmin.xlane.f32.xlu0 %v965_v42 }
0x169b   : > { %v967_v44 = vpop.xlane.xlu0 %966 }
0x169c   : > { %vm968_vm10 = vcmp.eq.f32.partialorder %v965_v42, %v967_v44  ;;  %v973_v46 = vcvt.f32.s32 %v967_v44 }
0x169d   : > { %v969_v45 = vsel %vm968_vm10, %v964_v34, inf }
0x169e   : > { %970 = vmin.xlane.f32.xlu1 %v969_v45  ;;  %v974_v48 = vshll.u32 %v973_v46, 16 }
0x172b   : > { %v971_v47 = vpop.xlane.xlu1 %970 }
0x172c   : > { %v972_v50 = vcvt.f32.s32 %v971_v47 }
0x172e   : > { %v975_v49 = vadd.s32 %v974_v48, %v972_v50 }
0x1730   : > { %v976_v52 = vrot.slane %v975_v49, 4 }
0x1732   : > { %vm977_vm11 = vcmp.lt.s32.totalorder %v975_v49, %v976_v52 }
0x1733   : > { %v978_v51 = vsel %vm977_vm11, %v975_v49, %v976_v52 }
0x1734   : > { %v979_v53 = vrot.slane %v978_v51, 2 }
0x1736   : > { %vm980_vm12 = vcmp.lt.s32.totalorder %v978_v51, %v979_v53 }
0x1737   : > { %v981_v54 = vsel %vm980_vm12, %v978_v51, %v979_v53 }
0x1738   : > { %v982_v55 = vrot.slane %v981_v54, 1 }
0x173a   : > { %vm983_vm13 = vcmp.lt.s32.totalorder %v981_v54, %v982_v55 }
0x173b   : > { %v984_v56 = vsel %vm983_vm13, %v981_v54, %v982_v55 }
0x173c   : > { %1636 = vpush %v984_v56 }
0x176d   : > { %s1637_s19 = spop %1636 }
0x176e   : > { %v988_v57 = vstv %s1637_s19 }
0x176f   : > { %vm991_vm14 = vcmp.eq.s32.totalorder %v1766_v5, %v988_v57  ;;  %vm992_vm15 = vcmp.eq.s32.totalorder %v1806_v1, %v988_v57  ;;  %vm989_vm0 = vcmp.eq.s32.totalorder %v1780_v19, %v988_v57 }
0x1770   : > { %v993_v58 = vsel %vm991_vm14, %v1783_v24, 0.0  ;;  %v994_v59 = vsel %vm992_vm15, %v1808_v2, 0.0  ;;  %v990_v7 = vsel %vm989_vm0, 1.0, %v931_v23  ;;  %vm1104_vm14 = vcmp.eq.s32.totalorder %v1780_v19, 11 }
0x1771   : > { %v995_v60 = vsel %vm463_vm7, %v993_v58, 0.0  ;;  %v996_v61 = vsel %vm463_vm7, %v994_v59, 0.0  ;;  %vm1004_vm2 = vcmp.gt.f32.partialorder %v990_v7, 0.5 }
0x1772   : > { %v997_v62 = vadd.f32 %v996_v61, %v995_v60 }
0x1774   : > { %v998_v0 = vrot.slane %v997_v62, 4 }
0x1776   : > { %v999_v63 = vadd.f32 %v998_v0, %v997_v62 }
0x1778   : > { %v1000_v4 = vrot.slane %v999_v63, 2 }
0x177a   : > { %v1001_v3 = vadd.f32 %v1000_v4, %v999_v63 }
0x177c   : > { %v1002_v6 = vrot.slane %v1001_v3, 1 }
0x177e   : > { %v1003_v8 = vadd.f32 %v1002_v6, %v1001_v3 }
0x1780   : > { %v1005_v9 = vmin.f32 %v947_v28, %v1003_v8 }
0x1782   : > { %v1006_v10 = vsel %vm1004_vm2, 1e+30, %v1005_v9 }
0x1783   : > { %v1007_v11 = vsel %vm416_vm1, %v1006_v10, inf }
0x1784   : > { %1008 = vmin.xlane.f32.xlu0 %v1007_v11 }
0x1811   : > { %v1009_v12 = vpop.xlane.xlu0 %1008 }
0x1812   : > { %v1010_v13 = vrot.slane %v1009_v12, 4 }
0x1814   : > { %v1011_v15 = vmin.f32 %v1009_v12, %v1010_v13 }
0x1816   : > { %v1012_v16 = vrot.slane %v1011_v15, 2 }
0x1818   : > { %v1013_v18 = vmin.f32 %v1011_v15, %v1012_v16 }
0x181a   : > { %v1014_v17 = vrot.slane %v1013_v18, 1 }
0x181c   : > { %v1015_v21 = vmin.f32 %v1013_v18, %v1014_v17 }
0x181e   : > { %1638 = vpush %v1015_v21 }
0x184f   : > { %s1639_s20 = spop %1638 }
0x1850   : > { %v1017_v20 = vstv %s1639_s20 }
0x1851   : > { %vm1018_vm4 = vcmp.eq.f32.partialorder %v1006_v10, %v1017_v20  ;;  %v1046_v22 = vsel %vm1045_vm3, %v1017_v20, %v987_v38 }
0x1852   : > { %v1019_v23 = vsel %vm1018_vm4, %v1780_v19, 16 }
0x1853   : > { %v1020_v26 = vsel %vm416_vm1, %v1019_v23, 2147483647 }
0x1854   : > { %v1022_v27 = vshra.s32 %v1020_v26, 16  ;;  %v1021_v29 = vand.u32 65535, %v1020_v26 }
0x1856   : > { %v1024_v28 = vcvt.s32.f32 %v1022_v27  ;;  %v1023_v31 = vcvt.s32.f32 %v1021_v29 }
0x1858   : > { %1025 = vmin.xlane.f32.xlu1 %v1024_v28 }
0x18e5   : > { %v1026_v30 = vpop.xlane.xlu1 %1025 }
0x18e6   : > { %vm1027_vm5 = vcmp.eq.f32.partialorder %v1024_v28, %v1026_v30  ;;  %v1032_v32 = vcvt.f32.s32 %v1026_v30 }
0x18e7   : > { %v1028_v25 = vsel %vm1027_vm5, %v1023_v31, inf }
0x18e8   : > { %1029 = vmin.xlane.f32.xlu0 %v1028_v25  ;;  %v1033_v33 = vshll.u32 %v1032_v32, 16 }
0x1975   : > { %v1030_v35 = vpop.xlane.xlu0 %1029 }
0x1976   : > { %v1031_v37 = vcvt.f32.s32 %v1030_v35 }
0x1978   : > { %v1034_v36 = vadd.s32 %v1033_v33, %v1031_v37 }
0x197a   : > { %v1035_v39 = vrot.slane %v1034_v36, 4 }
0x197c   : > { %vm1036_vm6 = vcmp.lt.s32.totalorder %v1034_v36, %v1035_v39 }
0x197d   : > { %v1037_v38 = vsel %vm1036_vm6, %v1034_v36, %v1035_v39 }
0x197e   : > { %v1038_v40 = vrot.slane %v1037_v38, 2 }
0x1980   : > { %vm1039_vm8 = vcmp.lt.s32.totalorder %v1037_v38, %v1038_v40 }
0x1981   : > { %v1040_v41 = vsel %vm1039_vm8, %v1037_v38, %v1038_v40 }
0x1982   : > { %v1041_v42 = vrot.slane %v1040_v41, 1 }
0x1984   : > { %vm1042_vm9 = vcmp.lt.s32.totalorder %v1040_v41, %v1041_v42 }
0x1985   : > { %v1043_v43 = vsel %vm1042_vm9, %v1040_v41, %v1041_v42 }
0x1986   : > { %1640 = vpush %v1043_v43 }
0x19b7   : > { %s1641_s21 = spop %1640 }
0x19b8   : > { %v1047_v44 = vstv %s1641_s21 }
0x19b9   : > { %vm1050_vm10 = vcmp.eq.s32.totalorder %v1766_v5, %v1047_v44  ;;  %vm1051_vm11 = vcmp.eq.s32.totalorder %v1806_v1, %v1047_v44  ;;  %vm1048_vm12 = vcmp.eq.s32.totalorder %v1780_v19, %v1047_v44 }
0x19ba   : > { %v1052_v34 = vsel %vm1050_vm10, %v1783_v24, 0.0  ;;  %v1053_v45 = vsel %vm1051_vm11, %v1808_v2, 0.0  ;;  %v1049_v54 = vsel %vm1048_vm12, 1.0, %v990_v7  ;;  %vm1163_vm10 = vcmp.eq.s32.totalorder %v1780_v19, 12 }
0x19bb   : > { %v1054_v46 = vsel %vm463_vm7, %v1052_v34, 0.0  ;;  %v1055_v47 = vsel %vm463_vm7, %v1053_v45, 0.0  ;;  %vm1063_vm13 = vcmp.gt.f32.partialorder %v1049_v54, 0.5 }
0x19bc   : > { %v1056_v48 = vadd.f32 %v1055_v47, %v1054_v46 }
0x19be   : > { %v1057_v50 = vrot.slane %v1056_v48, 4 }
0x19c0   : > { %v1058_v49 = vadd.f32 %v1057_v50, %v1056_v48 }
0x19c2   : > { %v1059_v52 = vrot.slane %v1058_v49, 2 }
0x19c4   : > { %v1060_v51 = vadd.f32 %v1059_v52, %v1058_v49 }
0x19c6   : > { %v1061_v53 = vrot.slane %v1060_v51, 1 }
0x19c8   : > { %v1062_v55 = vadd.f32 %v1061_v53, %v1060_v51 }
0x19ca   : > { %v1064_v56 = vmin.f32 %v1006_v10, %v1062_v55 }
0x19cc   : > { %v1065_v57 = vsel %vm1063_vm13, 1e+30, %v1064_v56 }
0x19cd   : > { %v1066_v58 = vsel %vm416_vm1, %v1065_v57, inf }
0x19ce   : > { %1067 = vmin.xlane.f32.xlu1 %v1066_v58 }
0x1a5b   : > { %v1068_v59 = vpop.xlane.xlu1 %1067 }
0x1a5c   : > { %v1069_v60 = vrot.slane %v1068_v59, 4 }
0x1a5e   : > { %v1070_v61 = vmin.f32 %v1068_v59, %v1069_v60 }
0x1a60   : > { %v1071_v62 = vrot.slane %v1070_v61, 2 }
0x1a62   : > { %v1072_v0 = vmin.f32 %v1070_v61, %v1071_v62 }
0x1a64   : > { %v1073_v63 = vrot.slane %v1072_v0, 1 }
0x1a66   : > { %v1074_v4 = vmin.f32 %v1072_v0, %v1073_v63 }
0x1a68   : > { %1642 = vpush %v1074_v4 }
0x1a99   : > { %s1643_s22 = spop %1642 }
0x1a9a   : > { %v1076_v3 = vstv %s1643_s22 }
0x1a9b   : > { %vm1077_vm15 = vcmp.eq.f32.partialorder %v1065_v57, %v1076_v3  ;;  %v1105_v6 = vsel %vm1104_vm14, %v1076_v3, %v1046_v22 }
0x1a9c   : > { %v1078_v7 = vsel %vm1077_vm15, %v1780_v19, 16 }
0x1a9d   : > { %v1079_v8 = vsel %vm416_vm1, %v1078_v7, 2147483647 }
0x1a9e   : > { %v1081_v9 = vshra.s32 %v1079_v8, 16  ;;  %v1080_v11 = vand.u32 65535, %v1079_v8 }
0x1aa0   : > { %v1083_v10 = vcvt.s32.f32 %v1081_v9  ;;  %v1082_v13 = vcvt.s32.f32 %v1080_v11 }
0x1aa2   : > { %1084 = vmin.xlane.f32.xlu0 %v1083_v10 }
0x1b2f   : > { %v1085_v12 = vpop.xlane.xlu0 %1084 }
0x1b30   : > { %vm1086_vm0 = vcmp.eq.f32.partialorder %v1083_v10, %v1085_v12  ;;  %v1091_v16 = vcvt.f32.s32 %v1085_v12 }
0x1b31   : > { %v1087_v15 = vsel %vm1086_vm0, %v1082_v13, inf }
0x1b32   : > { %1088 = vmin.xlane.f32.xlu1 %v1087_v15  ;;  %v1092_v17 = vshll.u32 %v1091_v16, 16 }
0x1bbf   : > { %v1089_v18 = vpop.xlane.xlu1 %1088 }
0x1bc0   : > { %v1090_v21 = vcvt.f32.s32 %v1089_v18 }
0x1bc2   : > { %v1093_v20 = vadd.s32 %v1092_v17, %v1090_v21 }
0x1bc4   : > { %v1094_v23 = vrot.slane %v1093_v20, 4 }
0x1bc6   : > { %vm1095_vm2 = vcmp.lt.s32.totalorder %v1093_v20, %v1094_v23 }
0x1bc7   : > { %v1096_v22 = vsel %vm1095_vm2, %v1093_v20, %v1094_v23 }
0x1bc8   : > { %v1097_v26 = vrot.slane %v1096_v22, 2 }
0x1bca   : > { %vm1098_vm3 = vcmp.lt.s32.totalorder %v1096_v22, %v1097_v26 }
0x1bcb   : > { %v1099_v27 = vsel %vm1098_vm3, %v1096_v22, %v1097_v26 }
0x1bcc   : > { %v1100_v28 = vrot.slane %v1099_v27, 1 }
0x1bce   : > { %vm1101_vm4 = vcmp.lt.s32.totalorder %v1099_v27, %v1100_v28 }
0x1bcf   : > { %v1102_v29 = vsel %vm1101_vm4, %v1099_v27, %v1100_v28 }
0x1bd0   : > { %1644 = vpush %v1102_v29 }
0x1c01   : > { %s1645_s23 = spop %1644 }
0x1c02   : > { %v1106_v30 = vstv %s1645_s23 }
0x1c03   : > { %vm1109_vm5 = vcmp.eq.s32.totalorder %v1766_v5, %v1106_v30  ;;  %vm1110_vm6 = vcmp.eq.s32.totalorder %v1806_v1, %v1106_v30  ;;  %vm1107_vm8 = vcmp.eq.s32.totalorder %v1780_v19, %v1106_v30 }
0x1c04   : > { %v1111_v31 = vsel %vm1109_vm5, %v1783_v24, 0.0  ;;  %v1112_v25 = vsel %vm1110_vm6, %v1808_v2, 0.0  ;;  %v1108_v41 = vsel %vm1107_vm8, 1.0, %v1049_v54  ;;  %vm1222_vm5 = vcmp.eq.s32.totalorder %v1780_v19, 13 }
0x1c05   : > { %v1113_v32 = vsel %vm463_vm7, %v1111_v31, 0.0  ;;  %v1114_v35 = vsel %vm463_vm7, %v1112_v25, 0.0  ;;  %vm1122_vm9 = vcmp.gt.f32.partialorder %v1108_v41, 0.5 }
0x1c06   : > { %v1115_v33 = vadd.f32 %v1114_v35, %v1113_v32 }
0x1c08   : > { %v1116_v37 = vrot.slane %v1115_v33, 4 }
0x1c0a   : > { %v1117_v36 = vadd.f32 %v1116_v37, %v1115_v33 }
0x1c0c   : > { %v1118_v39 = vrot.slane %v1117_v36, 2 }
0x1c0e   : > { %v1119_v38 = vadd.f32 %v1118_v39, %v1117_v36 }
0x1c10   : > { %v1120_v40 = vrot.slane %v1119_v38, 1 }
0x1c12   : > { %v1121_v42 = vadd.f32 %v1120_v40, %v1119_v38 }
0x1c14   : > { %v1123_v43 = vmin.f32 %v1065_v57, %v1121_v42 }
0x1c16   : > { %v1124_v44 = vsel %vm1122_vm9, 1e+30, %v1123_v43 }
0x1c17   : > { %v1125_v34 = vsel %vm416_vm1, %v1124_v44, inf }
0x1c18   : > { %1126 = vmin.xlane.f32.xlu0 %v1125_v34 }
0x1ca5   : > { %v1127_v45 = vpop.xlane.xlu0 %1126 }
0x1ca6   : > { %v1128_v46 = vrot.slane %v1127_v45, 4 }
0x1ca8   : > { %v1129_v47 = vmin.f32 %v1127_v45, %v1128_v46 }
0x1caa   : > { %v1130_v48 = vrot.slane %v1129_v47, 2 }
0x1cac   : > { %v1131_v50 = vmin.f32 %v1129_v47, %v1130_v48  ;;  %v1263_v48 = vld [vmem:[%s2037_s3] sm:$0xff] }
0x1cae   : > { %v1132_v49 = vrot.slane %v1131_v50, 1 }
0x1cb0   : > { %v1133_v52 = vmin.f32 %v1131_v50, %v1132_v49  ;;  %v1270_v50 = vld [vmem:[%s2036_s2] sm:$0xff] }
0x1cb2   : > { %1646 = vpush %v1133_v52 }
0x1ce3   : > { %s1647_s24 = spop %1646 }
0x1ce4   : > { %v1135_v51 = vstv %s1647_s24 }
0x1ce5   : > { %vm1136_vm11 = vcmp.eq.f32.partialorder %v1124_v44, %v1135_v51  ;;  %v1164_v53 = vsel %vm1163_vm10, %v1135_v51, %v1105_v6 }
0x1ce6   : > { %v1137_v54 = vsel %vm1136_vm11, %v1780_v19, 16 }
0x1ce7   : > { %v1138_v55 = vsel %vm416_vm1, %v1137_v54, 2147483647 }
0x1ce8   : > { %v1140_v56 = vshra.s32 %v1138_v55, 16  ;;  %v1139_v58 = vand.u32 65535, %v1138_v55 }
0x1cea   : > { %v1142_v57 = vcvt.s32.f32 %v1140_v56  ;;  %v1141_v60 = vcvt.s32.f32 %v1139_v58 }
0x1cec   : > { %1143 = vmin.xlane.f32.xlu1 %v1142_v57 }
0x1d79   : > { %v1144_v59 = vpop.xlane.xlu1 %1143 }
0x1d7a   : > { %vm1145_vm12 = vcmp.eq.f32.partialorder %v1142_v57, %v1144_v59  ;;  %v1150_v62 = vcvt.f32.s32 %v1144_v59 }
0x1d7b   : > { %v1146_v61 = vsel %vm1145_vm12, %v1141_v60, inf }
0x1d7c   : > { %1147 = vmin.xlane.f32.xlu0 %v1146_v61  ;;  %v1151_v63 = vshll.u32 %v1150_v62, 16 }
0x1e09   : > { %v1148_v0 = vpop.xlane.xlu0 %1147 }
0x1e0a   : > { %v1149_v4 = vcvt.f32.s32 %v1148_v0 }
0x1e0c   : > { %v1152_v3 = vadd.s32 %v1151_v63, %v1149_v4 }
0x1e0e   : > { %v1153_v7 = vrot.slane %v1152_v3, 4 }
0x1e10   : > { %vm1154_vm13 = vcmp.lt.s32.totalorder %v1152_v3, %v1153_v7 }
0x1e11   : > { %v1155_v6 = vsel %vm1154_vm13, %v1152_v3, %v1153_v7 }
0x1e12   : > { %v1156_v8 = vrot.slane %v1155_v6, 2 }
0x1e14   : > { %vm1157_vm14 = vcmp.lt.s32.totalorder %v1155_v6, %v1156_v8 }
0x1e15   : > { %v1158_v9 = vsel %vm1157_vm14, %v1155_v6, %v1156_v8 }
0x1e16   : > { %v1159_v10 = vrot.slane %v1158_v9, 1 }
0x1e18   : > { %vm1160_vm15 = vcmp.lt.s32.totalorder %v1158_v9, %v1159_v10 }
0x1e19   : > { %v1161_v11 = vsel %vm1160_vm15, %v1158_v9, %v1159_v10 }
0x1e1a   : > { %1648 = vpush %v1161_v11 }
0x1e4b   : > { %s1649_s25 = spop %1648 }
0x1e4c   : > { %v1165_v12 = vstv %s1649_s25 }
0x1e4d   : > { %vm1168_vm0 = vcmp.eq.s32.totalorder %v1766_v5, %v1165_v12  ;;  %vm1169_vm2 = vcmp.eq.s32.totalorder %v1806_v1, %v1165_v12  ;;  %vm1166_vm3 = vcmp.eq.s32.totalorder %v1780_v19, %v1165_v12  ;;  %v1271_v12 = vld [vmem:[%s2038_s4] sm:$0xff] }
0x1e4e   : > { %v1170_v13 = vsel %vm1168_vm0, %v1783_v24, 0.0  ;;  %v1171_v15 = vsel %vm1169_vm2, %v1808_v2, 0.0  ;;  %v1962_v27 = vsel %vm1166_vm3, 1.0, %v1108_v41  ;;  %vm1288_vm2 = vcmask 121856  }
0x1e4f   : > { %v1172_v16 = vsel %vm463_vm7, %v1170_v13, 0.0  ;;  %v1173_v18 = vsel %vm463_vm7, %v1171_v15, 0.0  ;;  %vm1181_vm4 = vcmp.gt.f32.partialorder %v1962_v27, 0.5  ;;  %vm1300_vm3 = vcmask 64512  }
0x1e50   : > { %v1174_v17 = vadd.f32 %v1173_v18, %v1172_v16 }
0x1e52   : > { %v1175_v21 = vrot.slane %v1174_v17, 4 }
0x1e54   : > { %v1176_v20 = vadd.f32 %v1175_v21, %v1174_v17 }
0x1e56   : > { %v1177_v23 = vrot.slane %v1176_v20, 2 }
0x1e58   : > { %v1178_v22 = vadd.f32 %v1177_v23, %v1176_v20 }
0x1e5a   : > { %v1179_v26 = vrot.slane %v1178_v22, 1 }
0x1e5c   : > { %v1180_v28 = vadd.f32 %v1179_v26, %v1178_v22 }
0x1e5e   : > { %v1182_v29 = vmin.f32 %v1124_v44, %v1180_v28 }
0x1e60   : > { %v1965_v30 = vsel %vm1181_vm4, 1e+30, %v1182_v29  ;;  %vm1694_vm4 = vmmov 0  }
0x1e61   : > { %v1184_v31 = vsel %vm416_vm1, %v1965_v30, inf  ;;  %1589 = vmatprep.mubr.msk.f32.mxu1 %vm1694_vm4, %v1692_v14  ;;  %v1298_v14 = vld [vmem:[%s2040_s6 + $0x10] sm:$0xff] }
0x1e62   : > { %1185 = vmin.xlane.f32.xlu1 %v1184_v31 }
0x1eef   : > { %v1186_v25 = vpop.xlane.xlu1 %1185 }
0x1ef0   : > { %v1187_v32 = vrot.slane %v1186_v25, 4 }
0x1ef2   : > { %v1188_v35 = vmin.f32 %v1186_v25, %v1187_v32 }
0x1ef4   : > { %v1189_v33 = vrot.slane %v1188_v35, 2 }
0x1ef6   : > { %v1190_v37 = vmin.f32 %v1188_v35, %v1189_v33 }
0x1ef8   : > { %v1191_v36 = vrot.slane %v1190_v37, 1 }
0x1efa   : > { %v1192_v39 = vmin.f32 %v1190_v37, %v1191_v36 }
0x1efc   : > { %1650 = vpush %v1192_v39 }
0x1f2d   : > { %s1651_s26 = spop %1650 }
0x1f2e   : > { %v1194_v38 = vstv %s1651_s26 }
0x1f2f   : > { %vm1195_vm6 = vcmp.eq.f32.partialorder %v1965_v30, %v1194_v38  ;;  %v1971_v40 = vsel %vm1222_vm5, %v1194_v38, %v1164_v53  ;;  %vm1404_vm5 = vcmask 261120  }
0x1f30   : > { %v1196_v41 = vsel %vm1195_vm6, %v1780_v19, 16  ;;  %vm1478_vm6 = vcmask 1024  }
0x1f31   : > { %v1197_v42 = vsel %vm416_vm1, %v1196_v41, 2147483647  ;;  %v1292_v41 = vld [vmem:[%s2039_s5] sm:$0xff] }
0x1f32   : > { %v1199_v43 = vshra.s32 %v1197_v42, 16  ;;  %v1198_v34 = vand.u32 65535, %v1197_v42  ;;  %1575 = vmatprep.mubr.msk.f32.mxu0 %vm1300_vm3, %v1292_v41 }
0x1f34   : > { %v1201_v44 = vcvt.s32.f32 %v1199_v43  ;;  %v1200_v46 = vcvt.s32.f32 %v1198_v34  ;;  %v1293_v43 = vld [vmem:[%s2039_s5 + $0x8] sm:$0xff]  ;;  %v1295_v34 = vld [vmem:[%s2039_s5 + $0x18] sm:$0xff] }
0x1f36   : > { %1202 = vmin.xlane.f32.xlu0 %v1201_v44 }
0x1fc3   : > { %v1203_v45 = vpop.xlane.xlu0 %1202 }
0x1fc4   : > { %vm1204_vm8 = vcmp.eq.f32.partialorder %v1201_v44, %v1203_v45  ;;  %v1209_v49 = vcvt.f32.s32 %v1203_v45  ;;  %v1294_v44 = vld [vmem:[%s2039_s5 + $0x10] sm:$0xff]  ;;  %v1693_v45 = vmov 0.0|0.0  }
0x1fc5   : > { %v1205_v47 = vsel %vm1204_vm8, %v1200_v46, inf  ;;  %1592 = vmatprep.subr.bf16.mxu1 %v1693_v45  ;;  %v1297_v46 = vld [vmem:[%s2040_s6 + $0x8] sm:$0xff] }
0x1fc6   : > { %1206 = vmin.xlane.f32.xlu1 %v1205_v47  ;;  %v1210_v51 = vshll.u32 %v1209_v49, 16  ;;  %v1296_v47 = vld [vmem:[%s2040_s6] sm:$0xff] }
0x1fd7   : > { %1266 = vperm.xlu1 %1676, %v1263_v48  }
0x1fdb   : > { %1281 = vperm.xlu1 %1676, %v1270_v50  }
0x2053   : > { %v1207_v52 = vpop.xlane.xlu1 %1206 }
0x2054   : > { %v1208_v53 = vcvt.f32.s32 %v1207_v52 }
0x2056   : > { %v1211_v54 = vadd.s32 %v1210_v51, %v1208_v53  ;;  %v1299_v51 = vld [vmem:[%s2040_s6 + $0x18] sm:$0xff] }
0x2057   : > { %v1267_v31 = vpop.permute.xlu1 %1266 }
0x2058   : > { %v1212_v55 = vrot.slane %v1211_v54, 4 }
0x205a   : > { %vm1213_vm9 = vcmp.lt.s32.totalorder %v1211_v54, %v1212_v55 }
0x205b   : > { %v1214_v56 = vsel %vm1213_vm9, %v1211_v54, %v1212_v55  ;;  %v1282_v37 = vpop.permute.xlu1 %1281 }
0x205c   : > { %v1215_v57 = vrot.slane %v1214_v56, 2 }
0x205e   : > { %vm1216_vm10 = vcmp.lt.s32.totalorder %v1214_v56, %v1215_v57 }
0x205f   : > { %v1217_v58 = vsel %vm1216_vm10, %v1214_v56, %v1215_v57 }
0x2060   : > { %v1218_v59 = vrot.slane %v1217_v58, 1 }
0x2062   : > { %vm1219_vm11 = vcmp.lt.s32.totalorder %v1217_v58, %v1218_v59 }
0x2063   : > { %v1220_v60 = vsel %vm1219_vm11, %v1217_v58, %v1218_v59 }
0x2064   : > { %1652 = vpush %v1220_v60 }
0x2095   : > { %s1653_s12 = spop %1652 }
0x2096   : > { %v1224_v61 = vstv %s1653_s12 }
0x2097   : > { %vm1227_vm12 = vcmp.eq.s32.totalorder %v1766_v5, %v1224_v61  ;;  %vm1228_vm13 = vcmp.eq.s32.totalorder %v1806_v1, %v1224_v61  ;;  %vm1225_vm14 = vcmp.eq.s32.totalorder %v1780_v19, %v1224_v61 }
0x2098   : > { %v1229_v62 = vsel %vm1227_vm12, %v1783_v24, 0.0  ;;  %v1230_v0 = vsel %vm1228_vm13, %v1808_v2, 0.0  ;;  %v1226_v5 = vsel %vm1225_vm14, 1.0, %v1962_v27 }
0x2099   : > { %v1231_v63 = vsel %vm463_vm7, %v1229_v62, 0.0  ;;  %v1232_v4 = vsel %vm463_vm7, %v1230_v0, 0.0  ;;  %vm1240_vm15 = vcmp.gt.f32.partialorder %v1226_v5, 0.5  ;;  %vm1253_vm7 = vcmp.eq.s32.totalorder %v1780_v19, 14  ;;  %v1402_v0 = vld [vmem:[%s2041_s7] sm:$0x3] }
0x209a   : > { %v1233_v3 = vadd.f32 %v1232_v4, %v1231_v63  ;;  %v1403_v63 = vld [vmem:[%s2042_s8] sm:$0x3] }
0x209c   : > { %v1234_v7 = vrot.slane %v1233_v3, 4 }
0x209e   : > { %v1235_v6 = vadd.f32 %v1234_v7, %v1233_v3 }
0x20a0   : > { %v1236_v8 = vrot.slane %v1235_v6, 2 }
0x20a2   : > { %v1237_v9 = vadd.f32 %v1236_v8, %v1235_v6 }
0x20a4   : > { %v1238_v10 = vrot.slane %v1237_v9, 1 }
0x20a6   : > { %v1239_v11 = vadd.f32 %v1238_v10, %v1237_v9 }
0x20a8   : > { %v1241_v1 = vmin.f32 %v1965_v30, %v1239_v11 }
0x20aa   : > { %v1242_v24 = vsel %vm1240_vm15, 1e+30, %v1241_v1 }
0x20ab   : > { %v1243_v2 = vsel %vm416_vm1, %v1242_v24, inf }
0x20ac   : > { %1244 = vmin.xlane.f32.xlu0 %v1243_v2 }
0x20c2   : > { %1274 = vperm.xlu0 %1673, %v1271_v12  }
0x2139   : > { %v1245_v13 = vpop.xlane.xlu0 %1244 }
0x213a   : > { %v1246_v15 = vrot.slane %v1245_v13, 4 }
0x213c   : > { %v1247_v16 = vmin.f32 %v1245_v13, %v1246_v15 }
0x213e   : > { %v1248_v18 = vrot.slane %v1247_v16, 2 }
0x2140   : > { %v1249_v17 = vmin.f32 %v1247_v16, %v1248_v18 }
0x2141   : > { %v1275_v32 = vpop.permute.xlu0 %1274 }
0x2142   : > { %v1250_v21 = vrot.slane %v1249_v17, 1 }
0x2144   : > { %v1251_v20 = vmin.f32 %v1249_v17, %v1250_v21 }
0x2146   : > { %1654 = vpush %v1251_v20 }
0x2177   : > { %s1655_s15 = spop %1654 }
0x2178   : > { %v1254_v23 = vstv %s1655_s15  ;;  %s1553_s15 = sshll.u32 %s2045_s10, 1 }
0x2179   : > { %v1255_v22 = vsel %vm1253_vm7, %v1254_v23, %v1971_v40  ;;  %s347_s20 = scalar_lea.vmem %s2043_s9, %s1553_s15 }
0x217a   : > { %1677 = vrsqrt.f32 %v1255_v22  ;;  %vm1258_vm1 = vcmp.eq.f32.partialorder %v1255_v22, inf  ;;  %v1261_v28 = vand.u32 2147483648, %v1255_v22  ;;  %vm1260_vm0 = vcmp.eq.f32.partialorder %v1255_v22, 0.0 }
0x2184   : > { %v1678_v26 = vpop.eup %1677 }
0x2185   : > { %v1257_v27 = vmul.f32 %v1678_v26, %v1255_v22 }
0x2187   : > { %v1259_v29 = vsel %vm1258_vm1, %v1255_v22, %v1257_v27 }
0x2188   : > { %v1262_v30 = vsel %vm1260_vm0, %v1261_v28, %v1259_v29 }
0x2189   : > { %v1269_v25 = vsub.f32 %v1267_v31, %v1262_v30 }
0x218b   : > { %v1277_v35 = vmul.f32 %v1275_v32, %v1269_v25 }
0x218d   : > { %v1278_v33 = vmul.f32 %v1277_v35, %v1269_v25 }
0x218f   : > { %v1284_v36 = vadd.f32 %v1282_v37, %v1278_v33 }
0x2191   : > { %v1285_v19 = vsub.f32 0.0, %v1284_v36 }
0x2193   : > { %v1286_v39 = vmul.f32 1.442695, %v1285_v19 }
0x2195   : > { %1679 = vpow2.f32 %v1286_v39 }
0x219f   : > { %v1680_v38 = vpop.eup %1679 }
0x21a0   : > { %v1289_v40 = vsel %vm1288_vm2, %v1680_v38, 0.0 }
0x21a1   : > { %1290 = vadd.xlane.f32.xlu1 %v1289_v40 }
0x222e   : > { %v1291_v42 = vpop.xlane.xlu1 %1290 }
0x222f   : > { %1573 = vmatprep.subr.mxu0 %v1291_v42 }
0x2230   : > { %1574 = vmatpush3.msra.mxu0 %v1291_v42 }
0x2231   : > { %1576 = vmatmul.mubr.msk.f32.vlgmr.msra.gmra.mrb[0].mxu0 %vm1300_vm3, %v1293_v43 }
0x2232   : > { %1578 = vmatprep.mubr.msk.f32.mxu0 %vm1300_vm3, %v1294_v44 }
0x2235   : > { %1579 = vmatmul.mubr.msk.f32.gmra.mrb[2].mxu0 %vm1300_vm3, %v1295_v34 }
0x2304   : > { %v1577_v48 = vpop.f32.mrb[0].mxu0 }
0x2305   : > { %v1385_v50 = vadd.f32 %v1577_v48, %v1297_v46  ;;  %v1379_v49 = vpop.f32.mrb[1].mxu0 }
0x2306   : > { %v1380_v52 = vadd.f32 %v1379_v49, %v1296_v47 }
0x2307   : > { %v1399_v53 = vmax.f32 %v1385_v50, 0.0 }
0x2308   : > { %v1398_v54 = vmax.f32 %v1380_v52, 0.0  ;;  %v1580_v55 = vpop.f32.mrb[2].mxu0 }
0x2309   : > { %v1395_v56 = vadd.f32 %v1580_v55, %v1299_v51  ;;  %v1389_v57 = vpop.f32.mrb[3].mxu0 }
0x230a   : > { %v1390_v58 = vadd.f32 %v1389_v57, %v1298_v14  ;;  %v1593_v59 = vpack.c.bf16 %v1399_v53, %v1398_v54 }
0x230b   : > { %v1401_v60 = vmax.f32 %v1395_v56, 0.0 }
0x230c   : > { %v1400_v61 = vmax.f32 %v1390_v58, 0.0  ;;  %1594 = vmatpush3.bf16.msra.mxu1 %v1593_v59 }
0x230d   : > { %1595 = vmatprep.subr.bf16.mxu1 %v1693_v45 }
0x230e   : > { %v1596_v62 = vpack.c.bf16 %v1401_v60, %v1400_v61 }
0x2310   : > { %1597 = vmatpush3.bf16.msra.mxu1 %v1596_v62 }
0x2313   : > { %1590 = vmatmul.mubr.msk.f32.vlgmr.msra.gmra.mrb[0].mxu1 %vm1404_vm5, %v1402_v0 }
0x23e6   : > { %v1474_v4 = vpop.f32.mrb[0].mxu1 }
0x23e7   : > { %v1475_v3 = vadd.f32 %v1474_v4, %v1403_v63  ;;  %v1591_v7 = vpop.f32.mrb[1].mxu1 }
0x23e9   : > { %1479 = vst.msk [vmem:[%s347_s20] sm:$0x3] %vm1478_vm6, %v1475_v3 }
0x23ea PF: > { %s19_s30 = sadd.s32 1, %s1687_s30  }
0x23eb   : > { %p16_p4 = scmp.ge.s32.totalorder %s19_s30, 4  }
0x23ed   :  { %18 = sbr.rel (!%p16_p4) target bundleno = 1 (0x1), region = 89 }

</bundles_post_ra>
